<compile_context>
chip_gen: v5e
topology: v5e:2x2
jax: 0.10.0
libtpu: 0.0.40
codegen_flags: <defaults>
</compile_context>

<pallas_src>
import jax
import jax.numpy as jnp
from jax.experimental import pallas as pl
from jax.experimental.pallas import tpu as pltpu


def _make_mlp_kernel(H, tile_r, chunk):
    num_chunks = tile_r // chunk

    def kernel(x_ref, w1_ref, b1_ref, w2b_ref, b2_ref, w3_ref, b3_ref, o_ref):
        # Hoist the 41 small-layer scalars out of the chunk loop (SMEM reads).
        w1 = [w1_ref[j] for j in range(H)]
        b1 = [b1_ref[j] for j in range(H)]
        b2 = [b2_ref[k] for k in range(H)]
        w3 = [w3_ref[k] for k in range(H)]
        b3 = b3_ref[0]

        def chunk_body(c, carry):
            r0 = c * chunk
            if not isinstance(c, int):
                r0 = pl.multiple_of(r0, 8)
            xb = x_ref[pl.ds(r0, chunk), :]                      # (chunk, 128) samples

            # Layer-2 accumulators (H lane-dense slabs), built incrementally so
            # only xb, one h1 slab, one w2 slab and H accumulators are live.
            acc = [None] * H
            for j in range(H):
                # Layer 1 (K = 1): outer product -> broadcast FMA + relu on VPU.
                h1j = jnp.maximum(xb * w1[j] + b1[j], 0.0)
                for k in range(H):
                    # Pre-broadcast (chunk,128) slab of W2[j,k]: aligned vector
                    # load (idle vld slots) instead of a per-use scalar splat.
                    w2jk = w2b_ref[pl.ds((j * H + k) * chunk, chunk), :]
                    t = h1j * w2jk
                    acc[k] = t if acc[k] is None else acc[k] + t

            # Layer 3 (N = 1): weighted sum of relu'd hidden units.
            y = None
            for k in range(H):
                h2k = jnp.maximum(acc[k] + b2[k], 0.0)
                t = h2k * w3[k]
                y = t if y is None else y + t
            y = y + b3

            o_ref[pl.ds(r0, chunk), :] = y.astype(o_ref.dtype)
            return carry

        if num_chunks == 1:
            chunk_body(0, 0)
        else:
            # Partial unroll: cross-iteration visibility for the LLO scheduler.
            jax.lax.fori_loop(0, num_chunks, chunk_body, 0, unroll=2)

    return kernel


def deterministic_nn_forward(x, params, *, tile_r=1024, chunk=24):
    """Forward pass of Deterministic_NN.

    x: any shape; flattened like the PyTorch `x.view(-1, 1)`.
    params: dict with w1 (1,H), b1 (H,), w2 (H,H), b2 (H,), w3 (H,1), b3 (1,).
    Returns (N, 1) float32.
    """
    assert chunk % 8 == 0

    cdiv = lambda a, b: -(-a // b)

    x_flat = jnp.reshape(x, (-1,)).astype(jnp.float32)
    n = x_flat.shape[0]
    H = params["w1"].shape[1]

    # Lane-dense layout: 128 samples per row.
    rows = max(1, cdiv(n, 128))

    # Tile selection:
    #  * multiple of `chunk`, at most ~tile_r rows (amortizes grid-step overhead)
    #  * capped so the parallel grid has >= 2 steps when there is enough work
    #    (keeps both v7x TensorCores busy; harmless on v5e/v6e).
    chunks_total = cdiv(rows, chunk)
    tile_chunks_cap = max(1, cdiv(chunks_total, 2))
    tile_chunks = max(1, min(tile_r // chunk, tile_chunks_cap))
    tile_r_eff = tile_chunks * chunk

    rows_pad = cdiv(rows, tile_r_eff) * tile_r_eff
    n_pad = rows_pad * 128
    if n_pad != n:
        # Only the tail is padded so the (rows_pad, 128) reshape is legal;
        # padded samples produce garbage that is sliced off below.
        x_flat = jnp.pad(x_flat, (0, n_pad - n))
    x2d = x_flat.reshape(rows_pad, 128)

    f32 = jnp.float32
    # Small-layer scalars live in SMEM (flat f32 vectors).
    w1 = params["w1"].astype(f32).reshape(-1)   # (H,)
    b1 = params["b1"].astype(f32).reshape(-1)   # (H,)
    b2 = params["b2"].astype(f32).reshape(-1)   # (H,)
    w3 = params["w3"].astype(f32).reshape(-1)   # (H,)
    b3 = params["b3"].astype(f32).reshape(-1)   # (1,)

    # W2 pre-broadcast table: row block (j*H+k)*chunk .. +chunk is W2[j,k]
    # replicated over (chunk, 128). ~1.2 MiB for H=10, chunk=24; resident in
    # VMEM (constant block index across the grid => fetched once).
    w2_flat = params["w2"].astype(f32).reshape(-1)               # (H*H,), (in, out) row-major
    w2_tbl = jnp.broadcast_to(
        w2_flat[:, None, None], (H * H, chunk, 128)
    ).reshape(H * H * chunk, 128)

    grid = (rows_pad // tile_r_eff,)
    smem = pl.BlockSpec(memory_space=pltpu.MemorySpace.SMEM)

    kernel = _make_mlp_kernel(H, tile_r_eff, chunk)

    out = pl.pallas_call(
        kernel,
        out_shape=jax.ShapeDtypeStruct((rows_pad, 128), jnp.float32),
        grid=grid,
        in_specs=[
            pl.BlockSpec((tile_r_eff, 128), lambda i: (i, 0)),        # lane-dense x tile
            smem, smem,                                                # w1, b1
            pl.BlockSpec((H * H * chunk, 128), lambda i: (0, 0)),      # W2 broadcast table
            smem, smem, smem,                                          # b2, w3, b3
        ],
        out_specs=pl.BlockSpec((tile_r_eff, 128), lambda i: (i, 0)),
        compiler_params=pltpu.CompilerParams(
            dimension_semantics=("parallel",)),
    )(x2d, w1, b1, w2_tbl, b2, w3, b3)

    return out.reshape(-1)[:n].reshape(n, 1)


def init_params(key, input_size=1, num_nodes=10, output_size=1):
    """Deterministic synthetic init (shapes match DeterministicLayer(in, out))."""
    k1, k2, k3, k4, k5, k6 = jax.random.split(key, 6)
    s = 0.5
    return {
        "w1": s * jax.random.normal(k1, (input_size, num_nodes), jnp.float32),
        "b1": s * jax.random.normal(k2, (num_nodes,), jnp.float32),
        "w2": s * jax.random.normal(k3, (num_nodes, num_nodes), jnp.float32),
        "b2": s * jax.random.normal(k4, (num_nodes,), jnp.float32),
        "w3": s * jax.random.normal(k5, (num_nodes, output_size), jnp.float32),
        "b3": s * jax.random.normal(k6, (output_size,), jnp.float32),
    }


def _reference_forward(x, p):
    # Plain-JAX reference of the PyTorch forward.
    x2d = jnp.reshape(x, (-1, 1)).astype(jnp.float32)
    h1 = jax.nn.relu(x2d @ p["w1"] + p["b1"])
    h2 = jax.nn.relu(h1 @ p["w2"] + p["b2"])
    return h2 @ p["w3"] + p["b3"]


# TODO(synk): loss_function / sample_weights_from_prior / make_weights_from_sample are
# host-side parameter utilities (not part of the forward pass) and are not kernelized.

if __name__ == "__main__":
    key = jax.random.PRNGKey(0)
    kx1, kx2, kp = jax.random.split(key, 3)

    # Deterministic_NN(input_size=1, num_nodes=10, output_size=1)
    params = init_params(kp, input_size=1, num_nodes=10, output_size=1)

    # Small input (exercises the single-chunk / single-step path).
    x_small = jax.random.normal(kx1, (64,), jnp.float32)
    y_small = jax.block_until_ready(deterministic_nn_forward(x_small, params))
    y_small_ref = _reference_forward(x_small, params)
    assert y_small.shape == (64, 1)
    assert jnp.allclose(y_small, y_small_ref, atol=1e-5, rtol=1e-5)

    # Larger input (exercises the multi-step grid and the unrolled chunk loop).
    x_large = jax.random.normal(kx2, (50000,), jnp.float32)
    y_large = jax.block_until_ready(deterministic_nn_forward(x_large, params))
    y_large_ref = _reference_forward(x_large, params)
    assert y_large.shape == (50000, 1)
    assert jnp.allclose(y_large, y_large_ref, atol=1e-5, rtol=1e-5)

    print("KERNEL_OK")
</pallas_src>

<mosaic_0001>
module attributes {stable_mosaic.version = 11 : i64} {
  func.func @kernel(%arg0: i32, %arg1: memref<24x128xf32, #tpu.memory_space<vmem>>, %arg2: memref<10xf32, #tpu.memory_space<smem>>, %arg3: memref<10xf32, #tpu.memory_space<smem>>, %arg4: memref<2400x128xf32, #tpu.memory_space<vmem>>, %arg5: memref<10xf32, #tpu.memory_space<smem>>, %arg6: memref<10xf32, #tpu.memory_space<smem>>, %arg7: memref<1xf32, #tpu.memory_space<smem>>, %arg8: memref<24x128xf32, #tpu.memory_space<vmem>>) attributes {dimension_semantics = [#tpu.dimension_semantics<parallel>], iteration_bounds = array<i64: 1>, scalar_prefetch = 0 : i64, scratch_operands = 0 : i64, tpu.core_type = #tpu.core_type<tc>, window_params = [{transform_indices = @transform_0, window_bounds = array<i64: 24, 128>}, {transform_indices = @transform_1, window_bounds = array<i64: 10>}, {transform_indices = @transform_2, window_bounds = array<i64: 10>}, {pipeline_mode = #tpu.pipeline_mode<synchronous>, transform_indices = @transform_3, window_bounds = array<i64: 2400, 128>}, {transform_indices = @transform_4, window_bounds = array<i64: 10>}, {transform_indices = @transform_5, window_bounds = array<i64: 10>}, {transform_indices = @transform_6, window_bounds = array<i64: 1>}, {transform_indices = @transform_7, window_bounds = array<i64: 24, 128>}]} {
    %c0 = arith.constant 0 : index
    %0 = memref.load %arg2[%c0] : memref<10xf32, #tpu.memory_space<smem>>
    %c1 = arith.constant 1 : index
    %1 = memref.load %arg2[%c1] : memref<10xf32, #tpu.memory_space<smem>>
    %c2 = arith.constant 2 : index
    %2 = memref.load %arg2[%c2] : memref<10xf32, #tpu.memory_space<smem>>
    %c3 = arith.constant 3 : index
    %3 = memref.load %arg2[%c3] : memref<10xf32, #tpu.memory_space<smem>>
    %c4 = arith.constant 4 : index
    %4 = memref.load %arg2[%c4] : memref<10xf32, #tpu.memory_space<smem>>
    %c5 = arith.constant 5 : index
    %5 = memref.load %arg2[%c5] : memref<10xf32, #tpu.memory_space<smem>>
    %c6 = arith.constant 6 : index
    %6 = memref.load %arg2[%c6] : memref<10xf32, #tpu.memory_space<smem>>
    %c7 = arith.constant 7 : index
    %7 = memref.load %arg2[%c7] : memref<10xf32, #tpu.memory_space<smem>>
    %c8 = arith.constant 8 : index
    %8 = memref.load %arg2[%c8] : memref<10xf32, #tpu.memory_space<smem>>
    %c9 = arith.constant 9 : index
    %9 = memref.load %arg2[%c9] : memref<10xf32, #tpu.memory_space<smem>>
    %c0_0 = arith.constant 0 : index
    %10 = memref.load %arg3[%c0_0] : memref<10xf32, #tpu.memory_space<smem>>
    %c1_1 = arith.constant 1 : index
    %11 = memref.load %arg3[%c1_1] : memref<10xf32, #tpu.memory_space<smem>>
    %c2_2 = arith.constant 2 : index
    %12 = memref.load %arg3[%c2_2] : memref<10xf32, #tpu.memory_space<smem>>
    %c3_3 = arith.constant 3 : index
    %13 = memref.load %arg3[%c3_3] : memref<10xf32, #tpu.memory_space<smem>>
    %c4_4 = arith.constant 4 : index
    %14 = memref.load %arg3[%c4_4] : memref<10xf32, #tpu.memory_space<smem>>
    %c5_5 = arith.constant 5 : index
    %15 = memref.load %arg3[%c5_5] : memref<10xf32, #tpu.memory_space<smem>>
    %c6_6 = arith.constant 6 : index
    %16 = memref.load %arg3[%c6_6] : memref<10xf32, #tpu.memory_space<smem>>
    %c7_7 = arith.constant 7 : index
    %17 = memref.load %arg3[%c7_7] : memref<10xf32, #tpu.memory_space<smem>>
    %c8_8 = arith.constant 8 : index
    %18 = memref.load %arg3[%c8_8] : memref<10xf32, #tpu.memory_space<smem>>
    %c9_9 = arith.constant 9 : index
    %19 = memref.load %arg3[%c9_9] : memref<10xf32, #tpu.memory_space<smem>>
    %c0_10 = arith.constant 0 : index
    %20 = memref.load %arg5[%c0_10] : memref<10xf32, #tpu.memory_space<smem>>
    %c1_11 = arith.constant 1 : index
    %21 = memref.load %arg5[%c1_11] : memref<10xf32, #tpu.memory_space<smem>>
    %c2_12 = arith.constant 2 : index
    %22 = memref.load %arg5[%c2_12] : memref<10xf32, #tpu.memory_space<smem>>
    %c3_13 = arith.constant 3 : index
    %23 = memref.load %arg5[%c3_13] : memref<10xf32, #tpu.memory_space<smem>>
    %c4_14 = arith.constant 4 : index
    %24 = memref.load %arg5[%c4_14] : memref<10xf32, #tpu.memory_space<smem>>
    %c5_15 = arith.constant 5 : index
    %25 = memref.load %arg5[%c5_15] : memref<10xf32, #tpu.memory_space<smem>>
    %c6_16 = arith.constant 6 : index
    %26 = memref.load %arg5[%c6_16] : memref<10xf32, #tpu.memory_space<smem>>
    %c7_17 = arith.constant 7 : index
    %27 = memref.load %arg5[%c7_17] : memref<10xf32, #tpu.memory_space<smem>>
    %c8_18 = arith.constant 8 : index
    %28 = memref.load %arg5[%c8_18] : memref<10xf32, #tpu.memory_space<smem>>
    %c9_19 = arith.constant 9 : index
    %29 = memref.load %arg5[%c9_19] : memref<10xf32, #tpu.memory_space<smem>>
    %c0_20 = arith.constant 0 : index
    %30 = memref.load %arg6[%c0_20] : memref<10xf32, #tpu.memory_space<smem>>
    %c1_21 = arith.constant 1 : index
    %31 = memref.load %arg6[%c1_21] : memref<10xf32, #tpu.memory_space<smem>>
    %c2_22 = arith.constant 2 : index
    %32 = memref.load %arg6[%c2_22] : memref<10xf32, #tpu.memory_space<smem>>
    %c3_23 = arith.constant 3 : index
    %33 = memref.load %arg6[%c3_23] : memref<10xf32, #tpu.memory_space<smem>>
    %c4_24 = arith.constant 4 : index
    %34 = memref.load %arg6[%c4_24] : memref<10xf32, #tpu.memory_space<smem>>
    %c5_25 = arith.constant 5 : index
    %35 = memref.load %arg6[%c5_25] : memref<10xf32, #tpu.memory_space<smem>>
    %c6_26 = arith.constant 6 : index
    %36 = memref.load %arg6[%c6_26] : memref<10xf32, #tpu.memory_space<smem>>
    %c7_27 = arith.constant 7 : index
    %37 = memref.load %arg6[%c7_27] : memref<10xf32, #tpu.memory_space<smem>>
    %c8_28 = arith.constant 8 : index
    %38 = memref.load %arg6[%c8_28] : memref<10xf32, #tpu.memory_space<smem>>
    %c9_29 = arith.constant 9 : index
    %39 = memref.load %arg6[%c9_29] : memref<10xf32, #tpu.memory_space<smem>>
    %c0_30 = arith.constant 0 : index
    %40 = memref.load %arg7[%c0_30] : memref<1xf32, #tpu.memory_space<smem>>
    %c0_31 = arith.constant 0 : index
    %c0_32 = arith.constant 0 : index
    %41 = vector.load %arg1[%c0_31, %c0_32] : memref<24x128xf32, #tpu.memory_space<vmem>>, vector<24x128xf32>
    %42 = vector.broadcast %0 : f32 to vector<24x128xf32>
    %43 = arith.mulf %41, %42 : vector<24x128xf32>
    %44 = vector.broadcast %10 : f32 to vector<24x128xf32>
    %45 = arith.addf %43, %44 : vector<24x128xf32>
    %cst = arith.constant 0.000000e+00 : f32
    %46 = vector.broadcast %cst : f32 to vector<24x128xf32>
    %47 = arith.maximumf %45, %46 : vector<24x128xf32>
    %c0_33 = arith.constant 0 : index
    %c0_34 = arith.constant 0 : index
    %48 = vector.load %arg4[%c0_33, %c0_34] : memref<2400x128xf32, #tpu.memory_space<vmem>>, vector<24x128xf32>
    %49 = arith.mulf %47, %48 : vector<24x128xf32>
    %c24 = arith.constant 24 : index
    %c0_35 = arith.constant 0 : index
    %50 = vector.load %arg4[%c24, %c0_35] : memref<2400x128xf32, #tpu.memory_space<vmem>>, vector<24x128xf32>
    %51 = arith.mulf %47, %50 : vector<24x128xf32>
    %c48 = arith.constant 48 : index
    %c0_36 = arith.constant 0 : index
    %52 = vector.load %arg4[%c48, %c0_36] : memref<2400x128xf32, #tpu.memory_space<vmem>>, vector<24x128xf32>
    %53 = arith.mulf %47, %52 : vector<24x128xf32>
    %c72 = arith.constant 72 : index
    %c0_37 = arith.constant 0 : index
    %54 = vector.load %arg4[%c72, %c0_37] : memref<2400x128xf32, #tpu.memory_space<vmem>>, vector<24x128xf32>
    %55 = arith.mulf %47, %54 : vector<24x128xf32>
    %c96 = arith.constant 96 : index
    %c0_38 = arith.constant 0 : index
    %56 = vector.load %arg4[%c96, %c0_38] : memref<2400x128xf32, #tpu.memory_space<vmem>>, vector<24x128xf32>
    %57 = arith.mulf %47, %56 : vector<24x128xf32>
    %c120 = arith.constant 120 : index
    %c0_39 = arith.constant 0 : index
    %58 = vector.load %arg4[%c120, %c0_39] : memref<2400x128xf32, #tpu.memory_space<vmem>>, vector<24x128xf32>
    %59 = arith.mulf %47, %58 : vector<24x128xf32>
    %c144 = arith.constant 144 : index
    %c0_40 = arith.constant 0 : index
    %60 = vector.load %arg4[%c144, %c0_40] : memref<2400x128xf32, #tpu.memory_space<vmem>>, vector<24x128xf32>
    %61 = arith.mulf %47, %60 : vector<24x128xf32>
    %c168 = arith.constant 168 : index
    %c0_41 = arith.constant 0 : index
    %62 = vector.load %arg4[%c168, %c0_41] : memref<2400x128xf32, #tpu.memory_space<vmem>>, vector<24x128xf32>
    %63 = arith.mulf %47, %62 : vector<24x128xf32>
    %c192 = arith.constant 192 : index
    %c0_42 = arith.constant 0 : index
    %64 = vector.load %arg4[%c192, %c0_42] : memref<2400x128xf32, #tpu.memory_space<vmem>>, vector<24x128xf32>
    %65 = arith.mulf %47, %64 : vector<24x128xf32>
    %c216 = arith.constant 216 : index
    %c0_43 = arith.constant 0 : index
    %66 = vector.load %arg4[%c216, %c0_43] : memref<2400x128xf32, #tpu.memory_space<vmem>>, vector<24x128xf32>
    %67 = arith.mulf %47, %66 : vector<24x128xf32>
    %68 = vector.broadcast %1 : f32 to vector<24x128xf32>
    %69 = arith.mulf %41, %68 : vector<24x128xf32>
    %70 = vector.broadcast %11 : f32 to vector<24x128xf32>
    %71 = arith.addf %69, %70 : vector<24x128xf32>
    %cst_44 = arith.constant 0.000000e+00 : f32
    %72 = vector.broadcast %cst_44 : f32 to vector<24x128xf32>
    %73 = arith.maximumf %71, %72 : vector<24x128xf32>
    %c240 = arith.constant 240 : index
    %c0_45 = arith.constant 0 : index
    %74 = vector.load %arg4[%c240, %c0_45] : memref<2400x128xf32, #tpu.memory_space<vmem>>, vector<24x128xf32>
    %75 = arith.mulf %73, %74 : vector<24x128xf32>
    %76 = arith.addf %49, %75 : vector<24x128xf32>
    %c264 = arith.constant 264 : index
    %c0_46 = arith.constant 0 : index
    %77 = vector.load %arg4[%c264, %c0_46] : memref<2400x128xf32, #tpu.memory_space<vmem>>, vector<24x128xf32>
    %78 = arith.mulf %73, %77 : vector<24x128xf32>
    %79 = arith.addf %51, %78 : vector<24x128xf32>
    %c288 = arith.constant 288 : index
    %c0_47 = arith.constant 0 : index
    %80 = vector.load %arg4[%c288, %c0_47] : memref<2400x128xf32, #tpu.memory_space<vmem>>, vector<24x128xf32>
    %81 = arith.mulf %73, %80 : vector<24x128xf32>
    %82 = arith.addf %53, %81 : vector<24x128xf32>
    %c312 = arith.constant 312 : index
    %c0_48 = arith.constant 0 : index
    %83 = vector.load %arg4[%c312, %c0_48] : memref<2400x128xf32, #tpu.memory_space<vmem>>, vector<24x128xf32>
    %84 = arith.mulf %73, %83 : vector<24x128xf32>
    %85 = arith.addf %55, %84 : vector<24x128xf32>
    %c336 = arith.constant 336 : index
    %c0_49 = arith.constant 0 : index
    %86 = vector.load %arg4[%c336, %c0_49] : memref<2400x128xf32, #tpu.memory_space<vmem>>, vector<24x128xf32>
    %87 = arith.mulf %73, %86 : vector<24x128xf32>
    %88 = arith.addf %57, %87 : vector<24x128xf32>
    %c360 = arith.constant 360 : index
    %c0_50 = arith.constant 0 : index
    %89 = vector.load %arg4[%c360, %c0_50] : memref<2400x128xf32, #tpu.memory_space<vmem>>, vector<24x128xf32>
    %90 = arith.mulf %73, %89 : vector<24x128xf32>
    %91 = arith.addf %59, %90 : vector<24x128xf32>
    %c384 = arith.constant 384 : index
    %c0_51 = arith.constant 0 : index
    %92 = vector.load %arg4[%c384, %c0_51] : memref<2400x128xf32, #tpu.memory_space<vmem>>, vector<24x128xf32>
    %93 = arith.mulf %73, %92 : vector<24x128xf32>
    %94 = arith.addf %61, %93 : vector<24x128xf32>
    %c408 = arith.constant 408 : index
    %c0_52 = arith.constant 0 : index
    %95 = vector.load %arg4[%c408, %c0_52] : memref<2400x128xf32, #tpu.memory_space<vmem>>, vector<24x128xf32>
    %96 = arith.mulf %73, %95 : vector<24x128xf32>
    %97 = arith.addf %63, %96 : vector<24x128xf32>
    %c432 = arith.constant 432 : index
    %c0_53 = arith.constant 0 : index
    %98 = vector.load %arg4[%c432, %c0_53] : memref<2400x128xf32, #tpu.memory_space<vmem>>, vector<24x128xf32>
    %99 = arith.mulf %73, %98 : vector<24x128xf32>
    %100 = arith.addf %65, %99 : vector<24x128xf32>
    %c456 = arith.constant 456 : index
    %c0_54 = arith.constant 0 : index
    %101 = vector.load %arg4[%c456, %c0_54] : memref<2400x128xf32, #tpu.memory_space<vmem>>, vector<24x128xf32>
    %102 = arith.mulf %73, %101 : vector<24x128xf32>
    %103 = arith.addf %67, %102 : vector<24x128xf32>
    %104 = vector.broadcast %2 : f32 to vector<24x128xf32>
    %105 = arith.mulf %41, %104 : vector<24x128xf32>
    %106 = vector.broadcast %12 : f32 to vector<24x128xf32>
    %107 = arith.addf %105, %106 : vector<24x128xf32>
    %cst_55 = arith.constant 0.000000e+00 : f32
    %108 = vector.broadcast %cst_55 : f32 to vector<24x128xf32>
    %109 = arith.maximumf %107, %108 : vector<24x128xf32>
    %c480 = arith.constant 480 : index
    %c0_56 = arith.constant 0 : index
    %110 = vector.load %arg4[%c480, %c0_56] : memref<2400x128xf32, #tpu.memory_space<vmem>>, vector<24x128xf32>
    %111 = arith.mulf %109, %110 : vector<24x128xf32>
    %112 = arith.addf %76, %111 : vector<24x128xf32>
    %c504 = arith.constant 504 : index
    %c0_57 = arith.constant 0 : index
    %113 = vector.load %arg4[%c504, %c0_57] : memref<2400x128xf32, #tpu.memory_space<vmem>>, vector<24x128xf32>
    %114 = arith.mulf %109, %113 : vector<24x128xf32>
    %115 = arith.addf %79, %114 : vector<24x128xf32>
    %c528 = arith.constant 528 : index
    %c0_58 = arith.constant 0 : index
    %116 = vector.load %arg4[%c528, %c0_58] : memref<2400x128xf32, #tpu.memory_space<vmem>>, vector<24x128xf32>
    %117 = arith.mulf %109, %116 : vector<24x128xf32>
    %118 = arith.addf %82, %117 : vector<24x128xf32>
    %c552 = arith.constant 552 : index
    %c0_59 = arith.constant 0 : index
    %119 = vector.load %arg4[%c552, %c0_59] : memref<2400x128xf32, #tpu.memory_space<vmem>>, vector<24x128xf32>
    %120 = arith.mulf %109, %119 : vector<24x128xf32>
    %121 = arith.addf %85, %120 : vector<24x128xf32>
    %c576 = arith.constant 576 : index
    %c0_60 = arith.constant 0 : index
    %122 = vector.load %arg4[%c576, %c0_60] : memref<2400x128xf32, #tpu.memory_space<vmem>>, vector<24x128xf32>
    %123 = arith.mulf %109, %122 : vector<24x128xf32>
    %124 = arith.addf %88, %123 : vector<24x128xf32>
    %c600 = arith.constant 600 : index
    %c0_61 = arith.constant 0 : index
    %125 = vector.load %arg4[%c600, %c0_61] : memref<2400x128xf32, #tpu.memory_space<vmem>>, vector<24x128xf32>
    %126 = arith.mulf %109, %125 : vector<24x128xf32>
    %127 = arith.addf %91, %126 : vector<24x128xf32>
    %c624 = arith.constant 624 : index
    %c0_62 = arith.constant 0 : index
    %128 = vector.load %arg4[%c624, %c0_62] : memref<2400x128xf32, #tpu.memory_space<vmem>>, vector<24x128xf32>
    %129 = arith.mulf %109, %128 : vector<24x128xf32>
    %130 = arith.addf %94, %129 : vector<24x128xf32>
    %c648 = arith.constant 648 : index
    %c0_63 = arith.constant 0 : index
    %131 = vector.load %arg4[%c648, %c0_63] : memref<2400x128xf32, #tpu.memory_space<vmem>>, vector<24x128xf32>
    %132 = arith.mulf %109, %131 : vector<24x128xf32>
    %133 = arith.addf %97, %132 : vector<24x128xf32>
    %c672 = arith.constant 672 : index
    %c0_64 = arith.constant 0 : index
    %134 = vector.load %arg4[%c672, %c0_64] : memref<2400x128xf32, #tpu.memory_space<vmem>>, vector<24x128xf32>
    %135 = arith.mulf %109, %134 : vector<24x128xf32>
    %136 = arith.addf %100, %135 : vector<24x128xf32>
    %c696 = arith.constant 696 : index
    %c0_65 = arith.constant 0 : index
    %137 = vector.load %arg4[%c696, %c0_65] : memref<2400x128xf32, #tpu.memory_space<vmem>>, vector<24x128xf32>
    %138 = arith.mulf %109, %137 : vector<24x128xf32>
    %139 = arith.addf %103, %138 : vector<24x128xf32>
    %140 = vector.broadcast %3 : f32 to vector<24x128xf32>
    %141 = arith.mulf %41, %140 : vector<24x128xf32>
    %142 = vector.broadcast %13 : f32 to vector<24x128xf32>
    %143 = arith.addf %141, %142 : vector<24x128xf32>
    %cst_66 = arith.constant 0.000000e+00 : f32
    %144 = vector.broadcast %cst_66 : f32 to vector<24x128xf32>
    %145 = arith.maximumf %143, %144 : vector<24x128xf32>
    %c720 = arith.constant 720 : index
    %c0_67 = arith.constant 0 : index
    %146 = vector.load %arg4[%c720, %c0_67] : memref<2400x128xf32, #tpu.memory_space<vmem>>, vector<24x128xf32>
    %147 = arith.mulf %145, %146 : vector<24x128xf32>
    %148 = arith.addf %112, %147 : vector<24x128xf32>
    %c744 = arith.constant 744 : index
    %c0_68 = arith.constant 0 : index
    %149 = vector.load %arg4[%c744, %c0_68] : memref<2400x128xf32, #tpu.memory_space<vmem>>, vector<24x128xf32>
    %150 = arith.mulf %145, %149 : vector<24x128xf32>
    %151 = arith.addf %115, %150 : vector<24x128xf32>
    %c768 = arith.constant 768 : index
    %c0_69 = arith.constant 0 : index
    %152 = vector.load %arg4[%c768, %c0_69] : memref<2400x128xf32, #tpu.memory_space<vmem>>, vector<24x128xf32>
    %153 = arith.mulf %145, %152 : vector<24x128xf32>
    %154 = arith.addf %118, %153 : vector<24x128xf32>
    %c792 = arith.constant 792 : index
    %c0_70 = arith.constant 0 : index
    %155 = vector.load %arg4[%c792, %c0_70] : memref<2400x128xf32, #tpu.memory_space<vmem>>, vector<24x128xf32>
    %156 = arith.mulf %145, %155 : vector<24x128xf32>
    %157 = arith.addf %121, %156 : vector<24x128xf32>
    %c816 = arith.constant 816 : index
    %c0_71 = arith.constant 0 : index
    %158 = vector.load %arg4[%c816, %c0_71] : memref<2400x128xf32, #tpu.memory_space<vmem>>, vector<24x128xf32>
    %159 = arith.mulf %145, %158 : vector<24x128xf32>
    %160 = arith.addf %124, %159 : vector<24x128xf32>
    %c840 = arith.constant 840 : index
    %c0_72 = arith.constant 0 : index
    %161 = vector.load %arg4[%c840, %c0_72] : memref<2400x128xf32, #tpu.memory_space<vmem>>, vector<24x128xf32>
    %162 = arith.mulf %145, %161 : vector<24x128xf32>
    %163 = arith.addf %127, %162 : vector<24x128xf32>
    %c864 = arith.constant 864 : index
    %c0_73 = arith.constant 0 : index
    %164 = vector.load %arg4[%c864, %c0_73] : memref<2400x128xf32, #tpu.memory_space<vmem>>, vector<24x128xf32>
    %165 = arith.mulf %145, %164 : vector<24x128xf32>
    %166 = arith.addf %130, %165 : vector<24x128xf32>
    %c888 = arith.constant 888 : index
    %c0_74 = arith.constant 0 : index
    %167 = vector.load %arg4[%c888, %c0_74] : memref<2400x128xf32, #tpu.memory_space<vmem>>, vector<24x128xf32>
    %168 = arith.mulf %145, %167 : vector<24x128xf32>
    %169 = arith.addf %133, %168 : vector<24x128xf32>
    %c912 = arith.constant 912 : index
    %c0_75 = arith.constant 0 : index
    %170 = vector.load %arg4[%c912, %c0_75] : memref<2400x128xf32, #tpu.memory_space<vmem>>, vector<24x128xf32>
    %171 = arith.mulf %145, %170 : vector<24x128xf32>
    %172 = arith.addf %136, %171 : vector<24x128xf32>
    %c936 = arith.constant 936 : index
    %c0_76 = arith.constant 0 : index
    %173 = vector.load %arg4[%c936, %c0_76] : memref<2400x128xf32, #tpu.memory_space<vmem>>, vector<24x128xf32>
    %174 = arith.mulf %145, %173 : vector<24x128xf32>
    %175 = arith.addf %139, %174 : vector<24x128xf32>
    %176 = vector.broadcast %4 : f32 to vector<24x128xf32>
    %177 = arith.mulf %41, %176 : vector<24x128xf32>
    %178 = vector.broadcast %14 : f32 to vector<24x128xf32>
    %179 = arith.addf %177, %178 : vector<24x128xf32>
    %cst_77 = arith.constant 0.000000e+00 : f32
    %180 = vector.broadcast %cst_77 : f32 to vector<24x128xf32>
    %181 = arith.maximumf %179, %180 : vector<24x128xf32>
    %c960 = arith.constant 960 : index
    %c0_78 = arith.constant 0 : index
    %182 = vector.load %arg4[%c960, %c0_78] : memref<2400x128xf32, #tpu.memory_space<vmem>>, vector<24x128xf32>
    %183 = arith.mulf %181, %182 : vector<24x128xf32>
    %184 = arith.addf %148, %183 : vector<24x128xf32>
    %c984 = arith.constant 984 : index
    %c0_79 = arith.constant 0 : index
    %185 = vector.load %arg4[%c984, %c0_79] : memref<2400x128xf32, #tpu.memory_space<vmem>>, vector<24x128xf32>
    %186 = arith.mulf %181, %185 : vector<24x128xf32>
    %187 = arith.addf %151, %186 : vector<24x128xf32>
    %c1008 = arith.constant 1008 : index
    %c0_80 = arith.constant 0 : index
    %188 = vector.load %arg4[%c1008, %c0_80] : memref<2400x128xf32, #tpu.memory_space<vmem>>, vector<24x128xf32>
    %189 = arith.mulf %181, %188 : vector<24x128xf32>
    %190 = arith.addf %154, %189 : vector<24x128xf32>
    %c1032 = arith.constant 1032 : index
    %c0_81 = arith.constant 0 : index
    %191 = vector.load %arg4[%c1032, %c0_81] : memref<2400x128xf32, #tpu.memory_space<vmem>>, vector<24x128xf32>
    %192 = arith.mulf %181, %191 : vector<24x128xf32>
    %193 = arith.addf %157, %192 : vector<24x128xf32>
    %c1056 = arith.constant 1056 : index
    %c0_82 = arith.constant 0 : index
    %194 = vector.load %arg4[%c1056, %c0_82] : memref<2400x128xf32, #tpu.memory_space<vmem>>, vector<24x128xf32>
    %195 = arith.mulf %181, %194 : vector<24x128xf32>
    %196 = arith.addf %160, %195 : vector<24x128xf32>
    %c1080 = arith.constant 1080 : index
    %c0_83 = arith.constant 0 : index
    %197 = vector.load %arg4[%c1080, %c0_83] : memref<2400x128xf32, #tpu.memory_space<vmem>>, vector<24x128xf32>
    %198 = arith.mulf %181, %197 : vector<24x128xf32>
    %199 = arith.addf %163, %198 : vector<24x128xf32>
    %c1104 = arith.constant 1104 : index
    %c0_84 = arith.constant 0 : index
    %200 = vector.load %arg4[%c1104, %c0_84] : memref<2400x128xf32, #tpu.memory_space<vmem>>, vector<24x128xf32>
    %201 = arith.mulf %181, %200 : vector<24x128xf32>
    %202 = arith.addf %166, %201 : vector<24x128xf32>
    %c1128 = arith.constant 1128 : index
    %c0_85 = arith.constant 0 : index
    %203 = vector.load %arg4[%c1128, %c0_85] : memref<2400x128xf32, #tpu.memory_space<vmem>>, vector<24x128xf32>
    %204 = arith.mulf %181, %203 : vector<24x128xf32>
    %205 = arith.addf %169, %204 : vector<24x128xf32>
    %c1152 = arith.constant 1152 : index
    %c0_86 = arith.constant 0 : index
    %206 = vector.load %arg4[%c1152, %c0_86] : memref<2400x128xf32, #tpu.memory_space<vmem>>, vector<24x128xf32>
    %207 = arith.mulf %181, %206 : vector<24x128xf32>
    %208 = arith.addf %172, %207 : vector<24x128xf32>
    %c1176 = arith.constant 1176 : index
    %c0_87 = arith.constant 0 : index
    %209 = vector.load %arg4[%c1176, %c0_87] : memref<2400x128xf32, #tpu.memory_space<vmem>>, vector<24x128xf32>
    %210 = arith.mulf %181, %209 : vector<24x128xf32>
    %211 = arith.addf %175, %210 : vector<24x128xf32>
    %212 = vector.broadcast %5 : f32 to vector<24x128xf32>
    %213 = arith.mulf %41, %212 : vector<24x128xf32>
    %214 = vector.broadcast %15 : f32 to vector<24x128xf32>
    %215 = arith.addf %213, %214 : vector<24x128xf32>
    %cst_88 = arith.constant 0.000000e+00 : f32
    %216 = vector.broadcast %cst_88 : f32 to vector<24x128xf32>
    %217 = arith.maximumf %215, %216 : vector<24x128xf32>
    %c1200 = arith.constant 1200 : index
    %c0_89 = arith.constant 0 : index
    %218 = vector.load %arg4[%c1200, %c0_89] : memref<2400x128xf32, #tpu.memory_space<vmem>>, vector<24x128xf32>
    %219 = arith.mulf %217, %218 : vector<24x128xf32>
    %220 = arith.addf %184, %219 : vector<24x128xf32>
    %c1224 = arith.constant 1224 : index
    %c0_90 = arith.constant 0 : index
    %221 = vector.load %arg4[%c1224, %c0_90] : memref<2400x128xf32, #tpu.memory_space<vmem>>, vector<24x128xf32>
    %222 = arith.mulf %217, %221 : vector<24x128xf32>
    %223 = arith.addf %187, %222 : vector<24x128xf32>
    %c1248 = arith.constant 1248 : index
    %c0_91 = arith.constant 0 : index
    %224 = vector.load %arg4[%c1248, %c0_91] : memref<2400x128xf32, #tpu.memory_space<vmem>>, vector<24x128xf32>
    %225 = arith.mulf %217, %224 : vector<24x128xf32>
    %226 = arith.addf %190, %225 : vector<24x128xf32>
    %c1272 = arith.constant 1272 : index
    %c0_92 = arith.constant 0 : index
    %227 = vector.load %arg4[%c1272, %c0_92] : memref<2400x128xf32, #tpu.memory_space<vmem>>, vector<24x128xf32>
    %228 = arith.mulf %217, %227 : vector<24x128xf32>
    %229 = arith.addf %193, %228 : vector<24x128xf32>
    %c1296 = arith.constant 1296 : index
    %c0_93 = arith.constant 0 : index
    %230 = vector.load %arg4[%c1296, %c0_93] : memref<2400x128xf32, #tpu.memory_space<vmem>>, vector<24x128xf32>
    %231 = arith.mulf %217, %230 : vector<24x128xf32>
    %232 = arith.addf %196, %231 : vector<24x128xf32>
    %c1320 = arith.constant 1320 : index
    %c0_94 = arith.constant 0 : index
    %233 = vector.load %arg4[%c1320, %c0_94] : memref<2400x128xf32, #tpu.memory_space<vmem>>, vector<24x128xf32>
    %234 = arith.mulf %217, %233 : vector<24x128xf32>
    %235 = arith.addf %199, %234 : vector<24x128xf32>
    %c1344 = arith.constant 1344 : index
    %c0_95 = arith.constant 0 : index
    %236 = vector.load %arg4[%c1344, %c0_95] : memref<2400x128xf32, #tpu.memory_space<vmem>>, vector<24x128xf32>
    %237 = arith.mulf %217, %236 : vector<24x128xf32>
    %238 = arith.addf %202, %237 : vector<24x128xf32>
    %c1368 = arith.constant 1368 : index
    %c0_96 = arith.constant 0 : index
    %239 = vector.load %arg4[%c1368, %c0_96] : memref<2400x128xf32, #tpu.memory_space<vmem>>, vector<24x128xf32>
    %240 = arith.mulf %217, %239 : vector<24x128xf32>
    %241 = arith.addf %205, %240 : vector<24x128xf32>
    %c1392 = arith.constant 1392 : index
    %c0_97 = arith.constant 0 : index
    %242 = vector.load %arg4[%c1392, %c0_97] : memref<2400x128xf32, #tpu.memory_space<vmem>>, vector<24x128xf32>
    %243 = arith.mulf %217, %242 : vector<24x128xf32>
    %244 = arith.addf %208, %243 : vector<24x128xf32>
    %c1416 = arith.constant 1416 : index
    %c0_98 = arith.constant 0 : index
    %245 = vector.load %arg4[%c1416, %c0_98] : memref<2400x128xf32, #tpu.memory_space<vmem>>, vector<24x128xf32>
    %246 = arith.mulf %217, %245 : vector<24x128xf32>
    %247 = arith.addf %211, %246 : vector<24x128xf32>
    %248 = vector.broadcast %6 : f32 to vector<24x128xf32>
    %249 = arith.mulf %41, %248 : vector<24x128xf32>
    %250 = vector.broadcast %16 : f32 to vector<24x128xf32>
    %251 = arith.addf %249, %250 : vector<24x128xf32>
    %cst_99 = arith.constant 0.000000e+00 : f32
    %252 = vector.broadcast %cst_99 : f32 to vector<24x128xf32>
    %253 = arith.maximumf %251, %252 : vector<24x128xf32>
    %c1440 = arith.constant 1440 : index
    %c0_100 = arith.constant 0 : index
    %254 = vector.load %arg4[%c1440, %c0_100] : memref<2400x128xf32, #tpu.memory_space<vmem>>, vector<24x128xf32>
    %255 = arith.mulf %253, %254 : vector<24x128xf32>
    %256 = arith.addf %220, %255 : vector<24x128xf32>
    %c1464 = arith.constant 1464 : index
    %c0_101 = arith.constant 0 : index
    %257 = vector.load %arg4[%c1464, %c0_101] : memref<2400x128xf32, #tpu.memory_space<vmem>>, vector<24x128xf32>
    %258 = arith.mulf %253, %257 : vector<24x128xf32>
    %259 = arith.addf %223, %258 : vector<24x128xf32>
    %c1488 = arith.constant 1488 : index
    %c0_102 = arith.constant 0 : index
    %260 = vector.load %arg4[%c1488, %c0_102] : memref<2400x128xf32, #tpu.memory_space<vmem>>, vector<24x128xf32>
    %261 = arith.mulf %253, %260 : vector<24x128xf32>
    %262 = arith.addf %226, %261 : vector<24x128xf32>
    %c1512 = arith.constant 1512 : index
    %c0_103 = arith.constant 0 : index
    %263 = vector.load %arg4[%c1512, %c0_103] : memref<2400x128xf32, #tpu.memory_space<vmem>>, vector<24x128xf32>
    %264 = arith.mulf %253, %263 : vector<24x128xf32>
    %265 = arith.addf %229, %264 : vector<24x128xf32>
    %c1536 = arith.constant 1536 : index
    %c0_104 = arith.constant 0 : index
    %266 = vector.load %arg4[%c1536, %c0_104] : memref<2400x128xf32, #tpu.memory_space<vmem>>, vector<24x128xf32>
    %267 = arith.mulf %253, %266 : vector<24x128xf32>
    %268 = arith.addf %232, %267 : vector<24x128xf32>
    %c1560 = arith.constant 1560 : index
    %c0_105 = arith.constant 0 : index
    %269 = vector.load %arg4[%c1560, %c0_105] : memref<2400x128xf32, #tpu.memory_space<vmem>>, vector<24x128xf32>
    %270 = arith.mulf %253, %269 : vector<24x128xf32>
    %271 = arith.addf %235, %270 : vector<24x128xf32>
    %c1584 = arith.constant 1584 : index
    %c0_106 = arith.constant 0 : index
    %272 = vector.load %arg4[%c1584, %c0_106] : memref<2400x128xf32, #tpu.memory_space<vmem>>, vector<24x128xf32>
    %273 = arith.mulf %253, %272 : vector<24x128xf32>
    %274 = arith.addf %238, %273 : vector<24x128xf32>
    %c1608 = arith.constant 1608 : index
    %c0_107 = arith.constant 0 : index
    %275 = vector.load %arg4[%c1608, %c0_107] : memref<2400x128xf32, #tpu.memory_space<vmem>>, vector<24x128xf32>
    %276 = arith.mulf %253, %275 : vector<24x128xf32>
    %277 = arith.addf %241, %276 : vector<24x128xf32>
    %c1632 = arith.constant 1632 : index
    %c0_108 = arith.constant 0 : index
    %278 = vector.load %arg4[%c1632, %c0_108] : memref<2400x128xf32, #tpu.memory_space<vmem>>, vector<24x128xf32>
    %279 = arith.mulf %253, %278 : vector<24x128xf32>
    %280 = arith.addf %244, %279 : vector<24x128xf32>
    %c1656 = arith.constant 1656 : index
    %c0_109 = arith.constant 0 : index
    %281 = vector.load %arg4[%c1656, %c0_109] : memref<2400x128xf32, #tpu.memory_space<vmem>>, vector<24x128xf32>
    %282 = arith.mulf %253, %281 : vector<24x128xf32>
    %283 = arith.addf %247, %282 : vector<24x128xf32>
    %284 = vector.broadcast %7 : f32 to vector<24x128xf32>
    %285 = arith.mulf %41, %284 : vector<24x128xf32>
    %286 = vector.broadcast %17 : f32 to vector<24x128xf32>
    %287 = arith.addf %285, %286 : vector<24x128xf32>
    %cst_110 = arith.constant 0.000000e+00 : f32
    %288 = vector.broadcast %cst_110 : f32 to vector<24x128xf32>
    %289 = arith.maximumf %287, %288 : vector<24x128xf32>
    %c1680 = arith.constant 1680 : index
    %c0_111 = arith.constant 0 : index
    %290 = vector.load %arg4[%c1680, %c0_111] : memref<2400x128xf32, #tpu.memory_space<vmem>>, vector<24x128xf32>
    %291 = arith.mulf %289, %290 : vector<24x128xf32>
    %292 = arith.addf %256, %291 : vector<24x128xf32>
    %c1704 = arith.constant 1704 : index
    %c0_112 = arith.constant 0 : index
    %293 = vector.load %arg4[%c1704, %c0_112] : memref<2400x128xf32, #tpu.memory_space<vmem>>, vector<24x128xf32>
    %294 = arith.mulf %289, %293 : vector<24x128xf32>
    %295 = arith.addf %259, %294 : vector<24x128xf32>
    %c1728 = arith.constant 1728 : index
    %c0_113 = arith.constant 0 : index
    %296 = vector.load %arg4[%c1728, %c0_113] : memref<2400x128xf32, #tpu.memory_space<vmem>>, vector<24x128xf32>
    %297 = arith.mulf %289, %296 : vector<24x128xf32>
    %298 = arith.addf %262, %297 : vector<24x128xf32>
    %c1752 = arith.constant 1752 : index
    %c0_114 = arith.constant 0 : index
    %299 = vector.load %arg4[%c1752, %c0_114] : memref<2400x128xf32, #tpu.memory_space<vmem>>, vector<24x128xf32>
    %300 = arith.mulf %289, %299 : vector<24x128xf32>
    %301 = arith.addf %265, %300 : vector<24x128xf32>
    %c1776 = arith.constant 1776 : index
    %c0_115 = arith.constant 0 : index
    %302 = vector.load %arg4[%c1776, %c0_115] : memref<2400x128xf32, #tpu.memory_space<vmem>>, vector<24x128xf32>
    %303 = arith.mulf %289, %302 : vector<24x128xf32>
    %304 = arith.addf %268, %303 : vector<24x128xf32>
    %c1800 = arith.constant 1800 : index
    %c0_116 = arith.constant 0 : index
    %305 = vector.load %arg4[%c1800, %c0_116] : memref<2400x128xf32, #tpu.memory_space<vmem>>, vector<24x128xf32>
    %306 = arith.mulf %289, %305 : vector<24x128xf32>
    %307 = arith.addf %271, %306 : vector<24x128xf32>
    %c1824 = arith.constant 1824 : index
    %c0_117 = arith.constant 0 : index
    %308 = vector.load %arg4[%c1824, %c0_117] : memref<2400x128xf32, #tpu.memory_space<vmem>>, vector<24x128xf32>
    %309 = arith.mulf %289, %308 : vector<24x128xf32>
    %310 = arith.addf %274, %309 : vector<24x128xf32>
    %c1848 = arith.constant 1848 : index
    %c0_118 = arith.constant 0 : index
    %311 = vector.load %arg4[%c1848, %c0_118] : memref<2400x128xf32, #tpu.memory_space<vmem>>, vector<24x128xf32>
    %312 = arith.mulf %289, %311 : vector<24x128xf32>
    %313 = arith.addf %277, %312 : vector<24x128xf32>
    %c1872 = arith.constant 1872 : index
    %c0_119 = arith.constant 0 : index
    %314 = vector.load %arg4[%c1872, %c0_119] : memref<2400x128xf32, #tpu.memory_space<vmem>>, vector<24x128xf32>
    %315 = arith.mulf %289, %314 : vector<24x128xf32>
    %316 = arith.addf %280, %315 : vector<24x128xf32>
    %c1896 = arith.constant 1896 : index
    %c0_120 = arith.constant 0 : index
    %317 = vector.load %arg4[%c1896, %c0_120] : memref<2400x128xf32, #tpu.memory_space<vmem>>, vector<24x128xf32>
    %318 = arith.mulf %289, %317 : vector<24x128xf32>
    %319 = arith.addf %283, %318 : vector<24x128xf32>
    %320 = vector.broadcast %8 : f32 to vector<24x128xf32>
    %321 = arith.mulf %41, %320 : vector<24x128xf32>
    %322 = vector.broadcast %18 : f32 to vector<24x128xf32>
    %323 = arith.addf %321, %322 : vector<24x128xf32>
    %cst_121 = arith.constant 0.000000e+00 : f32
    %324 = vector.broadcast %cst_121 : f32 to vector<24x128xf32>
    %325 = arith.maximumf %323, %324 : vector<24x128xf32>
    %c1920 = arith.constant 1920 : index
    %c0_122 = arith.constant 0 : index
    %326 = vector.load %arg4[%c1920, %c0_122] : memref<2400x128xf32, #tpu.memory_space<vmem>>, vector<24x128xf32>
    %327 = arith.mulf %325, %326 : vector<24x128xf32>
    %328 = arith.addf %292, %327 : vector<24x128xf32>
    %c1944 = arith.constant 1944 : index
    %c0_123 = arith.constant 0 : index
    %329 = vector.load %arg4[%c1944, %c0_123] : memref<2400x128xf32, #tpu.memory_space<vmem>>, vector<24x128xf32>
    %330 = arith.mulf %325, %329 : vector<24x128xf32>
    %331 = arith.addf %295, %330 : vector<24x128xf32>
    %c1968 = arith.constant 1968 : index
    %c0_124 = arith.constant 0 : index
    %332 = vector.load %arg4[%c1968, %c0_124] : memref<2400x128xf32, #tpu.memory_space<vmem>>, vector<24x128xf32>
    %333 = arith.mulf %325, %332 : vector<24x128xf32>
    %334 = arith.addf %298, %333 : vector<24x128xf32>
    %c1992 = arith.constant 1992 : index
    %c0_125 = arith.constant 0 : index
    %335 = vector.load %arg4[%c1992, %c0_125] : memref<2400x128xf32, #tpu.memory_space<vmem>>, vector<24x128xf32>
    %336 = arith.mulf %325, %335 : vector<24x128xf32>
    %337 = arith.addf %301, %336 : vector<24x128xf32>
    %c2016 = arith.constant 2016 : index
    %c0_126 = arith.constant 0 : index
    %338 = vector.load %arg4[%c2016, %c0_126] : memref<2400x128xf32, #tpu.memory_space<vmem>>, vector<24x128xf32>
    %339 = arith.mulf %325, %338 : vector<24x128xf32>
    %340 = arith.addf %304, %339 : vector<24x128xf32>
    %c2040 = arith.constant 2040 : index
    %c0_127 = arith.constant 0 : index
    %341 = vector.load %arg4[%c2040, %c0_127] : memref<2400x128xf32, #tpu.memory_space<vmem>>, vector<24x128xf32>
    %342 = arith.mulf %325, %341 : vector<24x128xf32>
    %343 = arith.addf %307, %342 : vector<24x128xf32>
    %c2064 = arith.constant 2064 : index
    %c0_128 = arith.constant 0 : index
    %344 = vector.load %arg4[%c2064, %c0_128] : memref<2400x128xf32, #tpu.memory_space<vmem>>, vector<24x128xf32>
    %345 = arith.mulf %325, %344 : vector<24x128xf32>
    %346 = arith.addf %310, %345 : vector<24x128xf32>
    %c2088 = arith.constant 2088 : index
    %c0_129 = arith.constant 0 : index
    %347 = vector.load %arg4[%c2088, %c0_129] : memref<2400x128xf32, #tpu.memory_space<vmem>>, vector<24x128xf32>
    %348 = arith.mulf %325, %347 : vector<24x128xf32>
    %349 = arith.addf %313, %348 : vector<24x128xf32>
    %c2112 = arith.constant 2112 : index
    %c0_130 = arith.constant 0 : index
    %350 = vector.load %arg4[%c2112, %c0_130] : memref<2400x128xf32, #tpu.memory_space<vmem>>, vector<24x128xf32>
    %351 = arith.mulf %325, %350 : vector<24x128xf32>
    %352 = arith.addf %316, %351 : vector<24x128xf32>
    %c2136 = arith.constant 2136 : index
    %c0_131 = arith.constant 0 : index
    %353 = vector.load %arg4[%c2136, %c0_131] : memref<2400x128xf32, #tpu.memory_space<vmem>>, vector<24x128xf32>
    %354 = arith.mulf %325, %353 : vector<24x128xf32>
    %355 = arith.addf %319, %354 : vector<24x128xf32>
    %356 = vector.broadcast %9 : f32 to vector<24x128xf32>
    %357 = arith.mulf %41, %356 : vector<24x128xf32>
    %358 = vector.broadcast %19 : f32 to vector<24x128xf32>
    %359 = arith.addf %357, %358 : vector<24x128xf32>
    %cst_132 = arith.constant 0.000000e+00 : f32
    %360 = vector.broadcast %cst_132 : f32 to vector<24x128xf32>
    %361 = arith.maximumf %359, %360 : vector<24x128xf32>
    %c2160 = arith.constant 2160 : index
    %c0_133 = arith.constant 0 : index
    %362 = vector.load %arg4[%c2160, %c0_133] : memref<2400x128xf32, #tpu.memory_space<vmem>>, vector<24x128xf32>
    %363 = arith.mulf %361, %362 : vector<24x128xf32>
    %364 = arith.addf %328, %363 : vector<24x128xf32>
    %c2184 = arith.constant 2184 : index
    %c0_134 = arith.constant 0 : index
    %365 = vector.load %arg4[%c2184, %c0_134] : memref<2400x128xf32, #tpu.memory_space<vmem>>, vector<24x128xf32>
    %366 = arith.mulf %361, %365 : vector<24x128xf32>
    %367 = arith.addf %331, %366 : vector<24x128xf32>
    %c2208 = arith.constant 2208 : index
    %c0_135 = arith.constant 0 : index
    %368 = vector.load %arg4[%c2208, %c0_135] : memref<2400x128xf32, #tpu.memory_space<vmem>>, vector<24x128xf32>
    %369 = arith.mulf %361, %368 : vector<24x128xf32>
    %370 = arith.addf %334, %369 : vector<24x128xf32>
    %c2232 = arith.constant 2232 : index
    %c0_136 = arith.constant 0 : index
    %371 = vector.load %arg4[%c2232, %c0_136] : memref<2400x128xf32, #tpu.memory_space<vmem>>, vector<24x128xf32>
    %372 = arith.mulf %361, %371 : vector<24x128xf32>
    %373 = arith.addf %337, %372 : vector<24x128xf32>
    %c2256 = arith.constant 2256 : index
    %c0_137 = arith.constant 0 : index
    %374 = vector.load %arg4[%c2256, %c0_137] : memref<2400x128xf32, #tpu.memory_space<vmem>>, vector<24x128xf32>
    %375 = arith.mulf %361, %374 : vector<24x128xf32>
    %376 = arith.addf %340, %375 : vector<24x128xf32>
    %c2280 = arith.constant 2280 : index
    %c0_138 = arith.constant 0 : index
    %377 = vector.load %arg4[%c2280, %c0_138] : memref<2400x128xf32, #tpu.memory_space<vmem>>, vector<24x128xf32>
    %378 = arith.mulf %361, %377 : vector<24x128xf32>
    %379 = arith.addf %343, %378 : vector<24x128xf32>
    %c2304 = arith.constant 2304 : index
    %c0_139 = arith.constant 0 : index
    %380 = vector.load %arg4[%c2304, %c0_139] : memref<2400x128xf32, #tpu.memory_space<vmem>>, vector<24x128xf32>
    %381 = arith.mulf %361, %380 : vector<24x128xf32>
    %382 = arith.addf %346, %381 : vector<24x128xf32>
    %c2328 = arith.constant 2328 : index
    %c0_140 = arith.constant 0 : index
    %383 = vector.load %arg4[%c2328, %c0_140] : memref<2400x128xf32, #tpu.memory_space<vmem>>, vector<24x128xf32>
    %384 = arith.mulf %361, %383 : vector<24x128xf32>
    %385 = arith.addf %349, %384 : vector<24x128xf32>
    %c2352 = arith.constant 2352 : index
    %c0_141 = arith.constant 0 : index
    %386 = vector.load %arg4[%c2352, %c0_141] : memref<2400x128xf32, #tpu.memory_space<vmem>>, vector<24x128xf32>
    %387 = arith.mulf %361, %386 : vector<24x128xf32>
    %388 = arith.addf %352, %387 : vector<24x128xf32>
    %c2376 = arith.constant 2376 : index
    %c0_142 = arith.constant 0 : index
    %389 = vector.load %arg4[%c2376, %c0_142] : memref<2400x128xf32, #tpu.memory_space<vmem>>, vector<24x128xf32>
    %390 = arith.mulf %361, %389 : vector<24x128xf32>
    %391 = arith.addf %355, %390 : vector<24x128xf32>
    %392 = vector.broadcast %20 : f32 to vector<24x128xf32>
    %393 = arith.addf %364, %392 : vector<24x128xf32>
    %cst_143 = arith.constant 0.000000e+00 : f32
    %394 = vector.broadcast %cst_143 : f32 to vector<24x128xf32>
    %395 = arith.maximumf %393, %394 : vector<24x128xf32>
    %396 = vector.broadcast %30 : f32 to vector<24x128xf32>
    %397 = arith.mulf %395, %396 : vector<24x128xf32>
    %398 = vector.broadcast %21 : f32 to vector<24x128xf32>
    %399 = arith.addf %367, %398 : vector<24x128xf32>
    %cst_144 = arith.constant 0.000000e+00 : f32
    %400 = vector.broadcast %cst_144 : f32 to vector<24x128xf32>
    %401 = arith.maximumf %399, %400 : vector<24x128xf32>
    %402 = vector.broadcast %31 : f32 to vector<24x128xf32>
    %403 = arith.mulf %401, %402 : vector<24x128xf32>
    %404 = arith.addf %397, %403 : vector<24x128xf32>
    %405 = vector.broadcast %22 : f32 to vector<24x128xf32>
    %406 = arith.addf %370, %405 : vector<24x128xf32>
    %cst_145 = arith.constant 0.000000e+00 : f32
    %407 = vector.broadcast %cst_145 : f32 to vector<24x128xf32>
    %408 = arith.maximumf %406, %407 : vector<24x128xf32>
    %409 = vector.broadcast %32 : f32 to vector<24x128xf32>
    %410 = arith.mulf %408, %409 : vector<24x128xf32>
    %411 = arith.addf %404, %410 : vector<24x128xf32>
    %412 = vector.broadcast %23 : f32 to vector<24x128xf32>
    %413 = arith.addf %373, %412 : vector<24x128xf32>
    %cst_146 = arith.constant 0.000000e+00 : f32
    %414 = vector.broadcast %cst_146 : f32 to vector<24x128xf32>
    %415 = arith.maximumf %413, %414 : vector<24x128xf32>
    %416 = vector.broadcast %33 : f32 to vector<24x128xf32>
    %417 = arith.mulf %415, %416 : vector<24x128xf32>
    %418 = arith.addf %411, %417 : vector<24x128xf32>
    %419 = vector.broadcast %24 : f32 to vector<24x128xf32>
    %420 = arith.addf %376, %419 : vector<24x128xf32>
    %cst_147 = arith.constant 0.000000e+00 : f32
    %421 = vector.broadcast %cst_147 : f32 to vector<24x128xf32>
    %422 = arith.maximumf %420, %421 : vector<24x128xf32>
    %423 = vector.broadcast %34 : f32 to vector<24x128xf32>
    %424 = arith.mulf %422, %423 : vector<24x128xf32>
    %425 = arith.addf %418, %424 : vector<24x128xf32>
    %426 = vector.broadcast %25 : f32 to vector<24x128xf32>
    %427 = arith.addf %379, %426 : vector<24x128xf32>
    %cst_148 = arith.constant 0.000000e+00 : f32
    %428 = vector.broadcast %cst_148 : f32 to vector<24x128xf32>
    %429 = arith.maximumf %427, %428 : vector<24x128xf32>
    %430 = vector.broadcast %35 : f32 to vector<24x128xf32>
    %431 = arith.mulf %429, %430 : vector<24x128xf32>
    %432 = arith.addf %425, %431 : vector<24x128xf32>
    %433 = vector.broadcast %26 : f32 to vector<24x128xf32>
    %434 = arith.addf %382, %433 : vector<24x128xf32>
    %cst_149 = arith.constant 0.000000e+00 : f32
    %435 = vector.broadcast %cst_149 : f32 to vector<24x128xf32>
    %436 = arith.maximumf %434, %435 : vector<24x128xf32>
    %437 = vector.broadcast %36 : f32 to vector<24x128xf32>
    %438 = arith.mulf %436, %437 : vector<24x128xf32>
    %439 = arith.addf %432, %438 : vector<24x128xf32>
    %440 = vector.broadcast %27 : f32 to vector<24x128xf32>
    %441 = arith.addf %385, %440 : vector<24x128xf32>
    %cst_150 = arith.constant 0.000000e+00 : f32
    %442 = vector.broadcast %cst_150 : f32 to vector<24x128xf32>
    %443 = arith.maximumf %441, %442 : vector<24x128xf32>
    %444 = vector.broadcast %37 : f32 to vector<24x128xf32>
    %445 = arith.mulf %443, %444 : vector<24x128xf32>
    %446 = arith.addf %439, %445 : vector<24x128xf32>
    %447 = vector.broadcast %28 : f32 to vector<24x128xf32>
    %448 = arith.addf %388, %447 : vector<24x128xf32>
    %cst_151 = arith.constant 0.000000e+00 : f32
    %449 = vector.broadcast %cst_151 : f32 to vector<24x128xf32>
    %450 = arith.maximumf %448, %449 : vector<24x128xf32>
    %451 = vector.broadcast %38 : f32 to vector<24x128xf32>
    %452 = arith.mulf %450, %451 : vector<24x128xf32>
    %453 = arith.addf %446, %452 : vector<24x128xf32>
    %454 = vector.broadcast %29 : f32 to vector<24x128xf32>
    %455 = arith.addf %391, %454 : vector<24x128xf32>
    %cst_152 = arith.constant 0.000000e+00 : f32
    %456 = vector.broadcast %cst_152 : f32 to vector<24x128xf32>
    %457 = arith.maximumf %455, %456 : vector<24x128xf32>
    %458 = vector.broadcast %39 : f32 to vector<24x128xf32>
    %459 = arith.mulf %457, %458 : vector<24x128xf32>
    %460 = arith.addf %453, %459 : vector<24x128xf32>
    %461 = vector.broadcast %40 : f32 to vector<24x128xf32>
    %462 = arith.addf %460, %461 : vector<24x128xf32>
    %c0_153 = arith.constant 0 : index
    %c0_154 = arith.constant 0 : index
    %463 = vector.load %arg8[%c0_153, %c0_154] : memref<24x128xf32, #tpu.memory_space<vmem>>, vector<24x128xf32>
    tpu.vector_store %arg8[%c0_153, %c0_154], %462 {strides = array<i32>} : memref<24x128xf32, #tpu.memory_space<vmem>>, vector<24x128xf32>,
    return
  }
  func.func @transform_0(%arg0: i32) -> (i32, i32) {
    %c0_i32 = arith.constant 0 : i32
    %c0_i32_0 = arith.constant 0 : i32
    return %arg0, %c0_i32 : i32, i32
  }
  func.func @transform_1(%arg0: i32) -> i32 {
    %c0_i32 = arith.constant 0 : i32
    %c0_i32_0 = arith.constant 0 : i32
    return %c0_i32 : i32
  }
  func.func @transform_2(%arg0: i32) -> i32 {
    %c0_i32 = arith.constant 0 : i32
    %c0_i32_0 = arith.constant 0 : i32
    return %c0_i32 : i32
  }
  func.func @transform_3(%arg0: i32) -> (i32, i32) {
    %c0_i32 = arith.constant 0 : i32
    %c0_i32_0 = arith.constant 0 : i32
    %c0_i32_1 = arith.constant 0 : i32
    return %c0_i32, %c0_i32_0 : i32, i32
  }
  func.func @transform_4(%arg0: i32) -> i32 {
    %c0_i32 = arith.constant 0 : i32
    %c0_i32_0 = arith.constant 0 : i32
    return %c0_i32 : i32
  }
  func.func @transform_5(%arg0: i32) -> i32 {
    %c0_i32 = arith.constant 0 : i32
    %c0_i32_0 = arith.constant 0 : i32
    return %c0_i32 : i32
  }
  func.func @transform_6(%arg0: i32) -> i32 {
    %c0_i32 = arith.constant 0 : i32
    %c0_i32_0 = arith.constant 0 : i32
    return %c0_i32 : i32
  }
  func.func @transform_7(%arg0: i32) -> (i32, i32) {
    %c0_i32 = arith.constant 0 : i32
    %c0_i32_0 = arith.constant 0 : i32
    return %arg0, %c0_i32 : i32, i32
  }
}

</mosaic_0001>

<bundles_post_ra>
// kernel: tpu_custom_call.1
= control target key start
LH: loop header
LB: loop body
LE: loop exit
PB: predicated region body
PF: predicated region fallthrough
CT: control target
= control target key end

     0   :  { %13 = vsyncpa [#allocation4], 0  ;;  %s3059_s0 = inlined_call_operand.hbm [shape: f32[24,128], index: 0, kind: input, shape index: {}]   ;;  %s3060_s1 = inlined_call_operand.hbm [shape: f32[10], index: 1, kind: input, shape index: {}]   ;;  %s3061_s2 = inlined_call_operand.hbm [shape: f32[10], index: 2, kind: input, shape index: {}]   ;;  %s3062_s3 = inlined_call_operand.hbm [shape: f32[2400,128], index: 3, kind: input, shape index: {}]   ;;  %s3063_s4 = inlined_call_operand.hbm [shape: f32[10], index: 4, kind: input, shape index: {}]   ;;  %s3064_s5 = inlined_call_operand.hbm [shape: f32[10], index: 5, kind: input, shape index: {}]   ;;  %s3065_s6 = inlined_call_operand.<no memory space> [shape: f32[1], index: 6, kind: input, shape index: {}]   ;;  %s3066_s7 = inlined_call_operand.hbm [shape: f32[24,128], index: 7, kind: output, shape index: {}]  }
   0x1   :  { %14 = vsyncpa [#allocation6], 0 }
   0x2   :  { %15 = vsyncpa [#allocation9], 0 }
   0x3   :  { %16 = vsyncpa [#allocation11], 0 }
   0x4   :  { %17 = vsyncpa [#allocation14], 0  ;;  %s46_s26 = sshll.u32 %s3061_s2, 4  ;;  %s47_s26 = int_to_ptr.hbm [resolvable:$true] %s46_s26 }
   0x5   :  { %18 = vsyncpa [#allocation5], 0  ;;  %s23_s29 = sshll.u32 %s3059_s0, 4  ;;  %s1481_s30 = smov [#allocation8]   ;;  %s24_s29 = int_to_ptr.hbm [resolvable:$true] %s23_s29 }
   0x6   :  { %49 = dma.hbm_to_smem %s47_s26, 16, %s1481_s30, [#allocation9]  }
   0x7   :  { %s1482_s8 = smov [#allocation3]   ;;  %s1483_s10 = smov 128  }
   0x8   :  { %s25_s9 = sshll.u32 %s1482_s8, 4  ;;  %s1484_s11 = smov 8   ;;  %s26_s9 = int_to_ptr.vmem [resolvable:$true] %s25_s9 }
   0x9   :  { %31 = dma.hbm_to_vmem [thread:$0]  %s24_s29, 384, %s26_s9, [#allocation4], %s1483_s10, %s1483_s10, %s1484_s11  }
   0xa   :  { %s37_s13 = sshll.u32 %s3060_s1, 4  ;;  %s54_s0 = sshll.u32 %s3062_s3, 4  ;;  %s38_s13 = int_to_ptr.hbm [resolvable:$true] %s37_s13  ;;  %s55_s0 = int_to_ptr.hbm [resolvable:$true] %s54_s0 }
   0xb   :  { %s1485_s16 = smov [#allocation7]   ;;  %s1486_s17 = smov [#allocation10]  }
   0xc   :  { %40 = dma.hbm_to_smem %s38_s13, 16, %s1485_s16, [#allocation6]  }
   0xd   :  { %s56_s18 = sshll.u32 %s1486_s17, 4  ;;  %s68_s21 = sshll.u32 %s3063_s4, 4  ;;  %s57_s18 = int_to_ptr.vmem [resolvable:$true] %s56_s18  ;;  %s69_s21 = int_to_ptr.hbm [resolvable:$true] %s68_s21 }
   0xe   :  { %62 = dma.hbm_to_vmem [thread:$0]  %s55_s0, 38400, %s57_s18, [#allocation11], %s1483_s10, %s1483_s10, %s1484_s11  }
   0xf   :  { %s77_s23 = sshll.u32 %s3064_s5, 4  ;;  %s1487_s3 = smov [#allocation12]   ;;  %s78_s23 = int_to_ptr.hbm [resolvable:$true] %s77_s23 }
  0x10   :  { %71 = dma.hbm_to_smem %s69_s21, 16, %s1487_s3, [#allocation9]  }
  0x11   :  { %s1488_s24 = smov [#allocation13]  }
  0x12   :  { %80 = dma.hbm_to_smem %s78_s23, 16, %s1488_s24, [#allocation14]  }
  0x13   :  { %1467 = dma.done.wait [#allocation4], 384  }
  0x14   :  { %1468 = vsyncadd [#allocation4], 4294966912 }
  0x15   :  { %1469 = dma.done.wait [#allocation6], 16  }
  0x16   :  { %1470 = vsyncadd [#allocation6], 4294967280 }
  0x17   :  { %1471 = dma.done.wait [#allocation9], 16  }
  0x18   :  { %1472 = vsyncadd [#allocation9], 4294967280 }
  0x19   :  { %1473 = dma.done.wait [#allocation11], 38400  }
  0x1a   :  { %1474 = vsyncadd [#allocation11], 4294928896 }
  0x1b   :  { %1475 = dma.done.wait [#allocation9], 16  }
  0x1c   :  { %1476 = vsyncadd [#allocation9], 4294967280 }
  0x1d   :  { %1477 = dma.done.wait [#allocation14], 16  }
  0x1e   :  { %1478 = vsyncadd [#allocation14], 4294967280 }
  0x1f   :  { %107 = sfence }
  0x20   :  { %s108_s4 = sld [smem:[#allocation7]]  ;;  %v1554_v0 = vld [vmem:[#allocation3] sm:$0xff]  ;;  %v1556_v1 = vld [vmem:[#allocation3 + $0x8] sm:$0xff]  ;;  %v1558_v2 = vld [vmem:[#allocation3 + $0x10] sm:$0xff] }
  0x21   :  { %s1299_s5 = sld [smem:[#allocation7 + $0x1]]  ;;  %3069 = vst [vmem:[#allocation23_spill] sm:$0xff] %v1558_v2  ;;  %v163_v17 = vld [vmem:[#allocation10] sm:$0xff]  ;;  %v164_v18 = vld [vmem:[#allocation10 + $0x8] sm:$0xff]  ;;  %v165_v19 = vld [vmem:[#allocation10 + $0x10] sm:$0xff] }
  0x22   :  { %s1300_s25 = sld [smem:[#allocation7 + $0x2]]  ;;  %v169_v20 = vld [vmem:[#allocation10 + $0x18] sm:$0xff]  ;;  %v170_v27 = vld [vmem:[#allocation10 + $0x20] sm:$0xff]  ;;  %v171_v28 = vld [vmem:[#allocation10 + $0x28] sm:$0xff] }
  0x23   :  { %s1301_s26 = sld [smem:[#allocation7 + $0x3]]  ;;  %v175_v29 = vld [vmem:[#allocation10 + $0x30] sm:$0xff]  ;;  %v176_v30 = vld [vmem:[#allocation10 + $0x38] sm:$0xff]  ;;  %v177_v32 = vld [vmem:[#allocation10 + $0x40] sm:$0xff] }
  0x24   :  { %s118_s27 = sld [smem:[#allocation8]]  ;;  %v181_v33 = vld [vmem:[#allocation10 + $0x48] sm:$0xff]  ;;  %v182_v34 = vld [vmem:[#allocation10 + $0x50] sm:$0xff]  ;;  %v183_v35 = vld [vmem:[#allocation10 + $0x58] sm:$0xff] }
  0x25   :  { %s1308_s28 = sld [smem:[#allocation8 + $0x1]]  ;;  %v187_v43 = vld [vmem:[#allocation10 + $0x60] sm:$0xff]  ;;  %v188_v44 = vld [vmem:[#allocation10 + $0x68] sm:$0xff]  ;;  %v189_v45 = vld [vmem:[#allocation10 + $0x70] sm:$0xff] }
  0x26   :  { %v152_v3 = vstv %s108_s4  ;;  %s1560_s29 = sld [smem:[#allocation8 + $0x2]]  ;;  %v193_v47 = vld [vmem:[#allocation10 + $0x78] sm:$0xff]  ;;  %v194_v48 = vld [vmem:[#allocation10 + $0x80] sm:$0xff]  ;;  %v195_v49 = vld [vmem:[#allocation10 + $0x88] sm:$0xff] }
  0x27   :  { %v223_v4 = vstv %s1299_s5  ;;  %v153_v6 = vmul.f32 %v152_v3, %v1554_v0  ;;  %v154_v7 = vmul.f32 %v152_v3, %v1556_v1  ;;  %v155_v8 = vmul.f32 %v152_v3, %v1558_v2  ;;  %v199_v58 = vld [vmem:[#allocation10 + $0x90] sm:$0xff]  ;;  %v200_v59 = vld [vmem:[#allocation10 + $0x98] sm:$0xff]  ;;  %v201_v60 = vld [vmem:[#allocation10 + $0xa0] sm:$0xff]  ;;  %s1805_s30 = sld [smem:[#allocation7 + $0x4]] }
  0x28   :  { %v324_v5 = vstv %s1300_s25  ;;  %v224_v10 = vmul.f32 %v223_v4, %v1554_v0  ;;  %v225_v11 = vmul.f32 %v223_v4, %v1556_v1  ;;  %v226_v12 = vmul.f32 %v223_v4, %v1558_v2  ;;  %v205_v4 = vld [vmem:[#allocation10 + $0xa8] sm:$0xff]  ;;  %s1817_s8 = sld [smem:[#allocation8 + $0x3]] }
  0x29   :  { %v425_v9 = vstv %s1301_s26  ;;  %v325_v13 = vmul.f32 %v324_v5, %v1554_v0  ;;  %v326_v14 = vmul.f32 %v324_v5, %v1556_v1  ;;  %v1571_v15 = vmul.f32 %v324_v5, %v1558_v2  ;;  %v206_v5 = vld [vmem:[#allocation10 + $0xb0] sm:$0xff]  ;;  %s1833_s9 = sld [smem:[#allocation7 + $0x5]] }
  0x2a   :  { %v156_v16 = vstv %s118_s27  ;;  %v1574_v21 = vmul.f32 %v425_v9, %v1554_v0  ;;  %v1577_v22 = vmul.f32 %v425_v9, %v1556_v1  ;;  %v1580_v23 = vmul.f32 %v425_v9, %v1558_v2  ;;  %s1847_s12 = sld [smem:[#allocation8 + $0x4]] }
  0x2b   :  { %v157_v24 = vadd.f32 %v156_v16, %v153_v6  ;;  %v158_v25 = vadd.f32 %v156_v16, %v154_v7  ;;  %v159_v26 = vadd.f32 %v156_v16, %v155_v8  ;;  %v227_v31 = vstv %s1308_s28  ;;  %v207_v6 = vld [vmem:[#allocation10 + $0xb8] sm:$0xff]  ;;  %s1857_s2 = sld [smem:[#allocation8 + $0x5]] }
  0x2c   :  { %v228_v36 = vadd.f32 %v227_v31, %v224_v10  ;;  %v229_v37 = vadd.f32 %v227_v31, %v225_v11  ;;  %v230_v38 = vadd.f32 %v227_v31, %v226_v12  ;;  %v1583_v39 = vstv %s1560_s29  ;;  %v211_v11 = vld [vmem:[#allocation10 + $0xc0] sm:$0xff]  ;;  %v212_v12 = vld [vmem:[#allocation10 + $0xc8] sm:$0xff]  ;;  %s2127_s13 = sld [smem:[#allocation7 + $0x6]] }
  0x2d   :  { %v160_v40 = vmax.f32 %v157_v24, 0.0  ;;  %v161_v41 = vmax.f32 %v158_v25, 0.0  ;;  %v162_v42 = vmax.f32 %v159_v26, 0.0  ;;  %v1586_v46 = vadd.f32 %v1583_v39, %v325_v13  ;;  %v213_v13 = vld [vmem:[#allocation10 + $0xd0] sm:$0xff]  ;;  %v219_v24 = vld [vmem:[#allocation10 + $0xe8] sm:$0xff]  ;;  %v236_v31 = vld [vmem:[#allocation10 + $0x100] sm:$0xff] }
  0x2e   :  { %v1588_v50 = vmax.f32 %v228_v36, 0.0  ;;  %v1590_v51 = vmax.f32 %v229_v37, 0.0  ;;  %v1592_v52 = vmax.f32 %v230_v38, 0.0  ;;  %v1595_v53 = vadd.f32 %v1583_v39, %v326_v14  ;;  %v243_v36 = vld [vmem:[#allocation10 + $0x108] sm:$0xff]  ;;  %v244_v37 = vld [vmem:[#allocation10 + $0x110] sm:$0xff]  ;;  %v245_v38 = vld [vmem:[#allocation10 + $0x118] sm:$0xff] }
  0x2f   :  { %v166_v54 = vmul.f32 %v163_v17, %v160_v40  ;;  %v167_v55 = vmul.f32 %v164_v18, %v161_v41  ;;  %v1597_v56 = vmul.f32 %v165_v19, %v162_v42  ;;  %v1599_v57 = vmul.f32 %v169_v20, %v160_v40  ;;  %v217_v19 = vld [vmem:[#allocation10 + $0xd8] sm:$0xff]  ;;  %v218_v20 = vld [vmem:[#allocation10 + $0xe0] sm:$0xff]  ;;  %s2147_s14 = sld [smem:[#allocation8 + $0x6]] }
  0x30   :  { %v173_v61 = vmul.f32 %v170_v27, %v161_v41  ;;  %v174_v62 = vmul.f32 %v171_v28, %v162_v42  ;;  %v1601_v63 = vmul.f32 %v175_v29, %v160_v40  ;;  %v1603_v3 = vmul.f32 %v176_v30, %v161_v41  ;;  %v234_v29 = vld [vmem:[#allocation10 + $0xf0] sm:$0xff]  ;;  %v235_v30 = vld [vmem:[#allocation10 + $0xf8] sm:$0xff]  ;;  %s2269_s15 = sld [smem:[#allocation7 + $0x7]] }
  0x31   :  { %v1605_v7 = vmul.f32 %v177_v32, %v162_v42  ;;  %v1607_v8 = vmul.f32 %v181_v33, %v160_v40  ;;  %v1609_v9 = vmul.f32 %v182_v34, %v161_v41  ;;  %v1611_v10 = vmul.f32 %v183_v35, %v162_v42  ;;  %s2281_s0 = sld [smem:[#allocation7 + $0x8]] }
  0x32   :  { %v1613_v14 = vmul.f32 %v187_v43, %v160_v40  ;;  %v1615_v16 = vmul.f32 %v188_v44, %v161_v41  ;;  %v1617_v17 = vmul.f32 %v189_v45, %v162_v42  ;;  %v1619_v18 = vmul.f32 %v193_v47, %v160_v40  ;;  %s2293_s16 = sld [smem:[#allocation8 + $0x7]] }
  0x33   :  { %v1621_v25 = vmul.f32 %v194_v48, %v161_v41  ;;  %v1623_v26 = vmul.f32 %v195_v49, %v162_v42  ;;  %v1625_v27 = vmul.f32 %v199_v58, %v160_v40  ;;  %v1627_v28 = vmul.f32 %v200_v59, %v161_v41  ;;  %v252_v48 = vld [vmem:[#allocation10 + $0x120] sm:$0xff]  ;;  %v253_v49 = vld [vmem:[#allocation10 + $0x128] sm:$0xff]  ;;  %s2431_s17 = sld [smem:[#allocation7 + $0x9]] }
  0x34   :  { %v1629_v32 = vmul.f32 %v201_v60, %v162_v42  ;;  %v1631_v33 = vmul.f32 %v205_v4, %v160_v40  ;;  %v1633_v34 = vmul.f32 %v206_v5, %v161_v41  ;;  %v1635_v35 = vmul.f32 %v207_v6, %v162_v42  ;;  %s2443_s18 = sld [smem:[#allocation8 + $0x8]] }
  0x35   :  { %v1637_v43 = vmul.f32 %v211_v11, %v160_v40  ;;  %v1639_v44 = vmul.f32 %v212_v12, %v161_v41  ;;  %v1641_v45 = vmul.f32 %v213_v13, %v162_v42  ;;  %v1643_v47 = vmul.f32 %v217_v19, %v160_v40  ;;  %v254_v40 = vld [vmem:[#allocation10 + $0x130] sm:$0xff]  ;;  %v261_v13 = vld [vmem:[#allocation10 + $0x138] sm:$0xff]  ;;  %v262_v19 = vld [vmem:[#allocation10 + $0x140] sm:$0xff]  ;;  %s2667_s19 = sld [smem:[#allocation8 + $0x9]] }
  0x36   :  { %v1645_v58 = vmul.f32 %v218_v20, %v161_v41  ;;  %v1647_v59 = vmul.f32 %v219_v24, %v162_v42  ;;  %v237_v60 = vmul.f32 %v234_v29, %v1588_v50  ;;  %v238_v4 = vmul.f32 %v235_v30, %v1590_v51  ;;  %v263_v24 = vld [vmem:[#allocation10 + $0x148] sm:$0xff]  ;;  %v270_v29 = vld [vmem:[#allocation10 + $0x150] sm:$0xff]  ;;  %v271_v30 = vld [vmem:[#allocation10 + $0x158] sm:$0xff]  ;;  %s2675_s20 = sld [smem:[#allocation12]] }
  0x37   :  { %v239_v5 = vmul.f32 %v236_v31, %v1592_v52  ;;  %v246_v6 = vmul.f32 %v243_v36, %v1588_v50  ;;  %v247_v11 = vmul.f32 %v244_v37, %v1590_v51  ;;  %v248_v12 = vmul.f32 %v245_v38, %v1592_v52  ;;  %s2687_s21 = sld [smem:[#allocation12 + $0x1]] }
  0x38   :  { %v1655_v2 = vadd.f32 %v237_v60, %v166_v54  ;;  %v1657_v41 = vadd.f32 %v238_v4, %v167_v55  ;;  %v255_v42 = vmul.f32 %v252_v48, %v1588_v50  ;;  %v256_v20 = vmul.f32 %v253_v49, %v1590_v51  ;;  %v272_v54 = vld [vmem:[#allocation10 + $0x160] sm:$0xff]  ;;  %v279_v55 = vld [vmem:[#allocation10 + $0x168] sm:$0xff]  ;;  %s2701_s1 = sld [smem:[#allocation12 + $0x2]] }
  0x39   :  { %v1662_v31 = vadd.f32 %v239_v5, %v1597_v56  ;;  %v1665_v36 = vadd.f32 %v246_v6, %v1599_v57  ;;  %v1667_v37 = vadd.f32 %v247_v11, %v173_v61  ;;  %v1669_v38 = vadd.f32 %v248_v12, %v174_v62  ;;  %v280_v5 = vld [vmem:[#allocation10 + $0x170] sm:$0xff]  ;;  %v281_v6 = vld [vmem:[#allocation10 + $0x178] sm:$0xff]  ;;  %v288_v11 = vld [vmem:[#allocation10 + $0x180] sm:$0xff]  ;;  %s2709_s22 = sld [smem:[#allocation12 + $0x3]] }
  0x3a   :  { %v257_v60 = vmul.f32 %v254_v40, %v1592_v52  ;;  %v1673_v48 = vadd.f32 %v255_v42, %v1601_v63  ;;  %v1676_v49 = vadd.f32 %v256_v20, %v1603_v3  ;;  %v264_v56 = vmul.f32 %v261_v13, %v1588_v50  ;;  %v289_v13 = vld [vmem:[#allocation10 + $0x188] sm:$0xff]  ;;  %v297_v42 = vld [vmem:[#allocation10 + $0x198] sm:$0xff]  ;;  %s2715_s23 = sld [smem:[#allocation12 + $0x4]] }
  0x3b   :  { %v265_v4 = vmul.f32 %v262_v19, %v1590_v51  ;;  %v266_v57 = vmul.f32 %v263_v24, %v1592_v52  ;;  %v273_v61 = vmul.f32 %v270_v29, %v1588_v50  ;;  %v274_v62 = vmul.f32 %v271_v30, %v1590_v51  ;;  %v290_v19 = vld [vmem:[#allocation10 + $0x190] sm:$0xff]  ;;  %v299_v30 = vld [vmem:[#allocation10 + $0x1a8] sm:$0xff]  ;;  %s2727_s3 = sld [smem:[#allocation13]] }
  0x3c   :  { %v1684_v12 = vadd.f32 %v257_v60, %v1605_v7  ;;  %v1687_v63 = vadd.f32 %v264_v56, %v1607_v8  ;;  %v275_v3 = vmul.f32 %v272_v54, %v1592_v52  ;;  %v282_v40 = vmul.f32 %v279_v55, %v1588_v50  ;;  %v298_v8 = vld [vmem:[#allocation10 + $0x1a0] sm:$0xff]  ;;  %s2739_s24 = sld [smem:[#allocation13 + $0x1]] }
  0x3d   :  { %v1692_v20 = vadd.f32 %v265_v4, %v1609_v9  ;;  %v1695_v24 = vadd.f32 %v266_v57, %v1611_v10  ;;  %v1698_v29 = vadd.f32 %v273_v61, %v1613_v14  ;;  %v1701_v7 = vadd.f32 %v274_v62, %v1615_v16  ;;  %v306_v4 = vld [vmem:[#allocation10 + $0x1b0] sm:$0xff]  ;;  %v307_v57 = vld [vmem:[#allocation10 + $0x1b8] sm:$0xff]  ;;  %v308_v61 = vld [vmem:[#allocation10 + $0x1c0] sm:$0xff]  ;;  %s2749_s4 = sld [smem:[#allocation13 + $0x2]] }
  0x3e   :  { %v1704_v54 = vadd.f32 %v275_v3, %v1617_v17  ;;  %v283_v55 = vmul.f32 %v280_v5, %v1590_v51  ;;  %v284_v60 = vmul.f32 %v281_v6, %v1592_v52  ;;  %v1709_v9 = vadd.f32 %v282_v40, %v1619_v18  ;;  %v315_v6 = vld [vmem:[#allocation10 + $0x1c8] sm:$0xff]  ;;  %v317_v3 = vld [vmem:[#allocation10 + $0x1d8] sm:$0xff]  ;;  %s2757_s5 = sld [smem:[#allocation13 + $0x3]] }
  0x3f   :  { %v291_v10 = vmul.f32 %v288_v11, %v1588_v50  ;;  %v292_v14 = vmul.f32 %v289_v13, %v1590_v51  ;;  %v293_v56 = vmul.f32 %v290_v19, %v1592_v52  ;;  %v300_v16 = vmul.f32 %v297_v42, %v1588_v50  ;;  %v316_v11 = vld [vmem:[#allocation10 + $0x1d0] sm:$0xff]  ;;  %s2977_s25 = sld [smem:[#allocation13 + $0x4]] }
  0x40   :  { %v1716_v17 = vadd.f32 %v283_v55, %v1621_v25  ;;  %v1719_v62 = vadd.f32 %v284_v60, %v1623_v26  ;;  %v301_v18 = vmul.f32 %v298_v8, %v1590_v51  ;;  %v302_v5 = vmul.f32 %v299_v30, %v1592_v52  ;;  %v344_v60 = vld [vmem:[#allocation10 + $0x1f8] sm:$0xff]  ;;  %s2980_s26 = sld [smem:[#allocation12 + $0x5]] }
  0x41   :  { %v1724_v40 = vadd.f32 %v291_v10, %v1625_v27  ;;  %v1727_v13 = vadd.f32 %v292_v14, %v1627_v28  ;;  %v1730_v19 = vadd.f32 %v293_v56, %v1629_v32  ;;  %v1733_v25 = vadd.f32 %v300_v16, %v1631_v33  ;;  %v335_v33 = vld [vmem:[#allocation10 + $0x1e0] sm:$0xff]  ;;  %v353_v10 = vld [vmem:[#allocation10 + $0x210] sm:$0xff]  ;;  %s2990_s27 = sld [smem:[#allocation13 + $0x5]] }
  0x42   :  { %v1736_v26 = vadd.f32 %v301_v18, %v1633_v34  ;;  %v1739_v42 = vadd.f32 %v302_v5, %v1635_v35  ;;  %v309_v8 = vmul.f32 %v306_v4, %v1588_v50  ;;  %v310_v27 = vmul.f32 %v307_v57, %v1590_v51  ;;  %v371_v16 = vld [vmem:[#allocation10 + $0x240] sm:$0xff]  ;;  %v336_v57 = vld [vmem:[#allocation10 + $0x1e8] sm:$0xff]  ;;  %v354_v5 = vld [vmem:[#allocation10 + $0x218] sm:$0xff]  ;;  %s2996_s28 = sld [smem:[#allocation12 + $0x6]] }
  0x43   :  { %v311_v30 = vmul.f32 %v308_v61, %v1592_v52  ;;  %v318_v28 = vmul.f32 %v315_v6, %v1588_v50  ;;  %v319_v32 = vmul.f32 %v316_v11, %v1590_v51  ;;  %v320_v55 = vmul.f32 %v317_v3, %v1592_v52  ;;  %v362_v50 = vld [vmem:[#allocation10 + $0x228] sm:$0xff]  ;;  %v380_v51 = vld [vmem:[#allocation10 + $0x258] sm:$0xff]  ;;  %v355_v6 = vld [vmem:[#allocation10 + $0x220] sm:$0xff]  ;;  %s3003_s29 = sld [smem:[#allocation13 + $0x6]] }
  0x44   :  { %v1748_v34 = vadd.f32 %v309_v8, %v1637_v43  ;;  %v1751_v35 = vadd.f32 %v310_v27, %v1639_v44  ;;  %v331_v14 = vadd.f32 %v1583_v39, %v1571_v15  ;;  %v1756_v56 = vmax.f32 %v1586_v46, 0.0  ;;  %v337_v15 = vld [vmem:[#allocation10 + $0x1f0] sm:$0xff]  ;;  %v345_v39 = vld [vmem:[#allocation10 + $0x200] sm:$0xff]  ;;  %v346_v18 = vld [vmem:[#allocation10 + $0x208] sm:$0xff] }
  0x45   :  { %v1759_v52 = vadd.f32 %v311_v30, %v1641_v45  ;;  %v1762_v4 = vadd.f32 %v318_v28, %v1643_v47  ;;  %v1765_v43 = vadd.f32 %v319_v32, %v1645_v58  ;;  %v1768_v44 = vadd.f32 %v320_v55, %v1647_v59  ;;  %v363_v28 = vld [vmem:[#allocation10 + $0x230] sm:$0xff] }
  0x46   :  { %v1771_v46 = vmax.f32 %v1595_v53, 0.0  ;;  %v1773_v61 = vmax.f32 %v331_v14, 0.0  ;;  %v338_v45 = vmul.f32 %v335_v33, %v1756_v56  ;;  %v347_v47 = vmul.f32 %v344_v60, %v1756_v56  ;;  %v372_v14 = vld [vmem:[#allocation10 + $0x248] sm:$0xff] }
  0x47   :  { %v356_v58 = vmul.f32 %v353_v10, %v1756_v56  ;;  %v365_v59 = vmul.f32 %v362_v50, %v1756_v56  ;;  %v374_v11 = vmul.f32 %v371_v16, %v1756_v56  ;;  %v383_v3 = vmul.f32 %v380_v51, %v1756_v56  ;;  %v364_v10 = vld [vmem:[#allocation10 + $0x238] sm:$0xff]  ;;  %v373_v50 = vld [vmem:[#allocation10 + $0x250] sm:$0xff] }
  0x48   :  { %v339_v53 = vmul.f32 %v336_v57, %v1771_v46  ;;  %v340_v8 = vmul.f32 %v337_v15, %v1773_v61  ;;  %v1784_v27 = vadd.f32 %v338_v45, %v1655_v2  ;;  %v348_v30 = vmul.f32 %v345_v39, %v1771_v46  ;;  %v382_v15 = vld [vmem:[#allocation10 + $0x268] sm:$0xff] }
  0x49   :  { %v349_v32 = vmul.f32 %v346_v18, %v1773_v61  ;;  %v1789_v55 = vadd.f32 %v347_v47, %v1665_v36  ;;  %v357_v33 = vmul.f32 %v354_v5, %v1771_v46  ;;  %v358_v60 = vmul.f32 %v355_v6, %v1773_v61  ;;  %v381_v36 = vld [vmem:[#allocation10 + $0x260] sm:$0xff]  ;;  %v389_v47 = vld [vmem:[#allocation10 + $0x270] sm:$0xff]  ;;  %v390_v5 = vld [vmem:[#allocation10 + $0x278] sm:$0xff] }
  0x4a   :  { %v1794_v16 = vadd.f32 %v339_v53, %v1657_v41  ;;  %v1797_v2 = vadd.f32 %v340_v8, %v1662_v31  ;;  %v1800_v51 = vadd.f32 %v348_v30, %v1667_v37  ;;  %v1803_v57 = vadd.f32 %v356_v58, %v1673_v48  ;;  %v398_v8 = vld [vmem:[#allocation10 + $0x288] sm:$0xff] }
  0x4b   :  { %v1808_v39 = vadd.f32 %v349_v32, %v1669_v38  ;;  %v1811_v45 = vadd.f32 %v357_v33, %v1676_v49  ;;  %v1814_v41 = vadd.f32 %v358_v60, %v1684_v12  ;;  %v366_v31 = vmul.f32 %v363_v28, %v1771_v46  ;;  %v391_v49 = vld [vmem:[#allocation10 + $0x280] sm:$0xff]  ;;  %v408_v32 = vld [vmem:[#allocation10 + $0x2a8] sm:$0xff] }
  0x4c   :  { %v367_v37 = vmul.f32 %v364_v10, %v1773_v61  ;;  %v1821_v48 = vadd.f32 %v365_v59, %v1687_v63  ;;  %v375_v18 = vmul.f32 %v372_v14, %v1771_v46  ;;  %v376_v38 = vmul.f32 %v373_v50, %v1773_v61  ;;  %v399_v63 = vld [vmem:[#allocation10 + $0x290] sm:$0xff]  ;;  %v400_v59 = vld [vmem:[#allocation10 + $0x298] sm:$0xff] }
  0x4d   :  { %v1826_v6 = vadd.f32 %v366_v31, %v1692_v20  ;;  %v1829_v12 = vadd.f32 %v374_v11, %v1698_v29  ;;  %v384_v58 = vmul.f32 %v381_v36, %v1771_v46  ;;  %v385_v53 = vmul.f32 %v382_v15, %v1773_v61  ;;  %v407_v11 = vld [vmem:[#allocation10 + $0x2a0] sm:$0xff]  ;;  %v409_v14 = vld [vmem:[#allocation10 + $0x2b0] sm:$0xff] }
  0x4e   :  { %v1836_v30 = vadd.f32 %v367_v37, %v1695_v24  ;;  %v1839_v28 = vadd.f32 %v375_v18, %v1701_v7  ;;  %v1842_v20 = vadd.f32 %v376_v38, %v1704_v54  ;;  %v1845_v29 = vadd.f32 %v383_v3, %v1709_v9  ;;  %v417_v31 = vld [vmem:[#allocation10 + $0x2c0] sm:$0xff]  ;;  %v418_v37 = vld [vmem:[#allocation10 + $0x2c8] sm:$0xff] }
  0x4f   :  { %v1850_v33 = vadd.f32 %v384_v58, %v1716_v17  ;;  %v1853_v60 = vadd.f32 %v385_v53, %v1719_v62  ;;  %v392_v24 = vmul.f32 %v389_v47, %v1756_v56  ;;  %v393_v7 = vmul.f32 %v390_v5, %v1771_v46  ;;  %v416_v17 = vld [vmem:[#allocation10 + $0x2b8] sm:$0xff] }
  0x50   :  { %v394_v54 = vmul.f32 %v391_v49, %v1773_v61  ;;  %v401_v9 = vmul.f32 %v398_v8, %v1756_v56  ;;  %v402_v3 = vmul.f32 %v399_v63, %v1771_v46  ;;  %v403_v10 = vmul.f32 %v400_v59, %v1773_v61  ;;  %v437_v59 = vld [vmem:[#allocation10 + $0x2d8] sm:$0xff] }
  0x51   :  { %v1864_v50 = vadd.f32 %v392_v24, %v1724_v40  ;;  %v1867_v62 = vadd.f32 %v393_v7, %v1727_v13  ;;  %v410_v36 = vmul.f32 %v407_v11, %v1756_v56  ;;  %v411_v15 = vmul.f32 %v408_v32, %v1771_v46  ;;  %v446_v11 = vld [vmem:[#allocation10 + $0x2f0] sm:$0xff]  ;;  %v447_v24 = vld [vmem:[#allocation10 + $0x2f8] sm:$0xff]  ;;  %v455_v7 = vld [vmem:[#allocation10 + $0x308] sm:$0xff] }
  0x52   :  { %v1872_v18 = vadd.f32 %v394_v54, %v1730_v19  ;;  %v1875_v38 = vadd.f32 %v401_v9, %v1733_v25  ;;  %v1878_v40 = vadd.f32 %v402_v3, %v1736_v26  ;;  %v1881_v47 = vadd.f32 %v403_v10, %v1739_v42 }
  0x53   :  { %v412_v13 = vmul.f32 %v409_v14, %v1773_v61  ;;  %v1885_v5 = vadd.f32 %v410_v36, %v1748_v34  ;;  %v1888_v49 = vadd.f32 %v411_v15, %v1751_v35  ;;  %v419_v19 = vmul.f32 %v416_v17, %v1756_v56  ;;  %v436_v35 = vld [vmem:[#allocation10 + $0x2d0] sm:$0xff] }
  0x54   :  { %v420_v58 = vmul.f32 %v417_v31, %v1771_v46  ;;  %v421_v25 = vmul.f32 %v418_v37, %v1773_v61  ;;  %v429_v53 = vstv %s1817_s8  ;;  %v526_v26 = vstv %s1805_s30  ;;  %v438_v61 = vld [vmem:[#allocation10 + $0x2e0] sm:$0xff]  ;;  %v456_v37 = vld [vmem:[#allocation10 + $0x310] sm:$0xff]  ;;  %s3007_s30 = sld [smem:[#allocation12 + $0x7]] }
  0x55   :  { %v1896_v8 = vadd.f32 %v412_v13, %v1759_v52  ;;  %v1899_v42 = vadd.f32 %v419_v19, %v1762_v4  ;;  %v430_v34 = vadd.f32 %v429_v53, %v1574_v21  ;;  %v431_v63 = vadd.f32 %v429_v53, %v1577_v22  ;;  %v445_v4 = vld [vmem:[#allocation10 + $0x2e8] sm:$0xff]  ;;  %s3016_s8 = sld [smem:[#allocation12 + $0x8]] }
  0x56   :  { %v1904_v56 = vadd.f32 %v420_v58, %v1765_v43  ;;  %v1907_v46 = vadd.f32 %v421_v25, %v1768_v44  ;;  %v432_v52 = vadd.f32 %v429_v53, %v1580_v23  ;;  %v1911_v21 = vmul.f32 %v526_v26, %v1554_v0  ;;  %v454_v43 = vld [vmem:[#allocation10 + $0x300] sm:$0xff]  ;;  %v3070_v44 = vld [vmem:[#allocation23_spill] sm:$0xff] }
  0x57   :  { %v1913_v22 = vmax.f32 %v430_v34, 0.0  ;;  %v1915_v32 = vmax.f32 %v431_v63, 0.0  ;;  %v1918_v54 = vmul.f32 %v526_v26, %v1556_v1  ;;  %v1921_v9 = vmul.f32 %v526_v26, %v3070_v44  ;;  %v463_v53 = vld [vmem:[#allocation10 + $0x318] sm:$0xff]  ;;  %v464_v26 = vld [vmem:[#allocation10 + $0x320] sm:$0xff]  ;;  %v465_v34 = vld [vmem:[#allocation10 + $0x328] sm:$0xff] }
  0x58   :  { %v1923_v23 = vmax.f32 %v432_v52, 0.0  ;;  %v1926_v3 = vstv %s1847_s12  ;;  %v1929_v10 = vstv %s1833_s9  ;;  %v1932_v14 = vstv %s1857_s2  ;;  %s3019_s9 = sld [smem:[#allocation13 + $0x7]] }
  0x59   :  { %v439_v17 = vmul.f32 %v436_v35, %v1913_v22  ;;  %v440_v36 = vmul.f32 %v437_v59, %v1915_v32  ;;  %v448_v15 = vmul.f32 %v445_v4, %v1913_v22  ;;  %v449_v31 = vmul.f32 %v446_v11, %v1915_v32  ;;  %v473_v4 = vld [vmem:[#allocation10 + $0x338] sm:$0xff]  ;;  %v474_v11 = vld [vmem:[#allocation10 + $0x340] sm:$0xff]  ;;  %s3025_s12 = sld [smem:[#allocation12 + $0x9]] }
  0x5a   :  { %v441_v13 = vmul.f32 %v438_v61, %v1923_v23  ;;  %v450_v19 = vmul.f32 %v447_v24, %v1923_v23  ;;  %v457_v58 = vmul.f32 %v454_v43, %v1913_v22  ;;  %v458_v25 = vmul.f32 %v455_v7, %v1915_v32  ;;  %v472_v61 = vld [vmem:[#allocation10 + $0x330] sm:$0xff]  ;;  %v481_v7 = vld [vmem:[#allocation10 + $0x348] sm:$0xff]  ;;  %s3028_s2 = sld [smem:[#allocation13 + $0x8]] }
  0x5b   :  { %v1943_v63 = vadd.f32 %v439_v17, %v1784_v27  ;;  %v1946_v35 = vadd.f32 %v440_v36, %v1794_v16  ;;  %v1949_v59 = vadd.f32 %v448_v15, %v1789_v55  ;;  %v1952_v52 = vadd.f32 %v449_v31, %v1800_v51 }
  0x5c   :  { %v1955_v24 = vadd.f32 %v441_v13, %v1797_v2  ;;  %v1958_v43 = vadd.f32 %v450_v19, %v1808_v39  ;;  %v459_v27 = vmul.f32 %v456_v37, %v1923_v23  ;;  %v1962_v16 = vadd.f32 %v457_v58, %v1803_v57  ;;  %v482_v2 = vld [vmem:[#allocation10 + $0x350] sm:$0xff]  ;;  %v483_v37 = vld [vmem:[#allocation10 + $0x358] sm:$0xff]  ;;  %v490_v13 = vld [vmem:[#allocation10 + $0x360] sm:$0xff] }
  0x5d   :  { %v1965_v55 = vadd.f32 %v458_v25, %v1811_v45  ;;  %v466_v51 = vmul.f32 %v463_v53, %v1913_v22  ;;  %v467_v17 = vmul.f32 %v464_v26, %v1915_v32  ;;  %v468_v36 = vmul.f32 %v465_v34, %v1923_v23  ;;  %v491_v45 = vld [vmem:[#allocation10 + $0x368] sm:$0xff]  ;;  %v492_v53 = vld [vmem:[#allocation10 + $0x370] sm:$0xff]  ;;  %v499_v26 = vld [vmem:[#allocation10 + $0x378] sm:$0xff] }
  0x5e   :  { %v1971_v15 = vadd.f32 %v459_v27, %v1814_v41  ;;  %v475_v39 = vmul.f32 %v472_v61, %v1913_v22  ;;  %v476_v31 = vmul.f32 %v473_v4, %v1915_v32  ;;  %v477_v57 = vmul.f32 %v474_v11, %v1923_v23  ;;  %v500_v34 = vld [vmem:[#allocation10 + $0x380] sm:$0xff]  ;;  %v501_v11 = vld [vmem:[#allocation10 + $0x388] sm:$0xff] }
  0x5f   :  { %v1977_v19 = vadd.f32 %v466_v51, %v1821_v48  ;;  %v1980_v58 = vadd.f32 %v467_v17, %v1826_v6  ;;  %v1983_v25 = vadd.f32 %v468_v36, %v1836_v30  ;;  %v484_v41 = vmul.f32 %v481_v7, %v1913_v22 }
  0x60   :  { %v1987_v61 = vadd.f32 %v475_v39, %v1829_v12  ;;  %v1990_v4 = vadd.f32 %v476_v31, %v1839_v28  ;;  %v1993_v48 = vadd.f32 %v477_v57, %v1842_v20  ;;  %v485_v6 = vmul.f32 %v482_v2, %v1915_v32  ;;  %v508_v12 = vld [vmem:[#allocation10 + $0x390] sm:$0xff]  ;;  %v509_v2 = vld [vmem:[#allocation10 + $0x398] sm:$0xff]  ;;  %v510_v39 = vld [vmem:[#allocation10 + $0x3a0] sm:$0xff] }
  0x61   :  { %v486_v30 = vmul.f32 %v483_v37, %v1923_v23  ;;  %v1998_v27 = vadd.f32 %v484_v41, %v1845_v29  ;;  %v493_v7 = vmul.f32 %v490_v13, %v1913_v22  ;;  %v494_v51 = vmul.f32 %v491_v45, %v1915_v32  ;;  %v517_v31 = vld [vmem:[#allocation10 + $0x3a8] sm:$0xff]  ;;  %v518_v13 = vld [vmem:[#allocation10 + $0x3b0] sm:$0xff]  ;;  %v519_v45 = vld [vmem:[#allocation10 + $0x3b8] sm:$0xff] }
  0x62   :  { %v2003_v17 = vadd.f32 %v485_v6, %v1850_v33  ;;  %v495_v28 = vmul.f32 %v492_v53, %v1923_v23  ;;  %v502_v20 = vmul.f32 %v499_v26, %v1913_v22  ;;  %v503_v36 = vmul.f32 %v500_v34, %v1915_v32 }
  0x63   :  { %v2009_v29 = vadd.f32 %v486_v30, %v1853_v60  ;;  %v2012_v57 = vadd.f32 %v493_v7, %v1864_v50  ;;  %v2015_v37 = vadd.f32 %v494_v51, %v1867_v62  ;;  %v504_v33 = vmul.f32 %v501_v11, %v1923_v23  ;;  %v537_v30 = vld [vmem:[#allocation10 + $0x3c0] sm:$0xff] }
  0x64   :  { %v2019_v41 = vadd.f32 %v495_v28, %v1872_v18  ;;  %v2022_v53 = vadd.f32 %v502_v20, %v1875_v38  ;;  %v2025_v26 = vadd.f32 %v503_v36, %v1878_v40  ;;  %v511_v60 = vmul.f32 %v508_v12, %v1913_v22  ;;  %v555_v12 = vld [vmem:[#allocation10 + $0x3f0] sm:$0xff]  ;;  %v547_v28 = vld [vmem:[#allocation10 + $0x3e0] sm:$0xff]  ;;  %v564_v20 = vld [vmem:[#allocation10 + $0x408] sm:$0xff] }
  0x65   :  { %v2029_v50 = vadd.f32 %v504_v33, %v1881_v47  ;;  %v512_v62 = vmul.f32 %v509_v2, %v1915_v32  ;;  %v513_v34 = vmul.f32 %v510_v39, %v1923_v23  ;;  %v520_v6 = vmul.f32 %v517_v31, %v1913_v22  ;;  %v538_v22 = vld [vmem:[#allocation10 + $0x3c8] sm:$0xff]  ;;  %v557_v33 = vld [vmem:[#allocation10 + $0x400] sm:$0xff] }
  0x66   :  { %v2035_v18 = vadd.f32 %v511_v60, %v1885_v5  ;;  %v521_v38 = vmul.f32 %v518_v13, %v1915_v32  ;;  %v522_v11 = vmul.f32 %v519_v45, %v1923_v23  ;;  %v531_v40 = vadd.f32 %v1926_v3, %v1911_v21  ;;  %v546_v32 = vld [vmem:[#allocation10 + $0x3d8] sm:$0xff]  ;;  %v548_v2 = vld [vmem:[#allocation10 + $0x3e8] sm:$0xff] }
  0x67   :  { %v2042_v47 = vadd.f32 %v512_v62, %v1888_v49  ;;  %v2045_v7 = vadd.f32 %v513_v34, %v1896_v8  ;;  %v2048_v51 = vadd.f32 %v520_v6, %v1899_v42  ;;  %v532_v5 = vadd.f32 %v1926_v3, %v1918_v54  ;;  %v556_v42 = vld [vmem:[#allocation10 + $0x3f8] sm:$0xff]  ;;  %v539_v54 = vld [vmem:[#allocation10 + $0x3d0] sm:$0xff] }
  0x68   :  { %v2053_v23 = vadd.f32 %v521_v38, %v1904_v56  ;;  %v2056_v21 = vadd.f32 %v522_v11, %v1907_v46  ;;  %v533_v49 = vadd.f32 %v1926_v3, %v1921_v9  ;;  %v2060_v8 = vmax.f32 %v531_v40, 0.0  ;;  %v565_v34 = vld [vmem:[#allocation10 + $0x410] sm:$0xff] }
  0x69   :  { %v2062_v36 = vmax.f32 %v532_v5, 0.0  ;;  %v2066_v39 = vmul.f32 %v1929_v10, %v1554_v0  ;;  %v2070_v56 = vmul.f32 %v1929_v10, %v1556_v1  ;;  %v2074_v46 = vmul.f32 %v1929_v10, %v3070_v44  ;;  %v573_v5 = vld [vmem:[#allocation10 + $0x420] sm:$0xff] }
  0x6a   :  { %v2076_v9 = vmax.f32 %v533_v49, 0.0  ;;  %v540_v3 = vmul.f32 %v537_v30, %v2060_v8  ;;  %v549_v31 = vmul.f32 %v546_v32, %v2060_v8  ;;  %v558_v13 = vmul.f32 %v555_v12, %v2060_v8  ;;  %v566_v30 = vld [vmem:[#allocation10 + $0x418] sm:$0xff] }
  0x6b   :  { %v541_v45 = vmul.f32 %v538_v22, %v2062_v36  ;;  %v550_v60 = vmul.f32 %v547_v28, %v2062_v36  ;;  %v559_v62 = vmul.f32 %v556_v42, %v2062_v36  ;;  %v567_v6 = vmul.f32 %v564_v20, %v2060_v8  ;;  %v575_v28 = vld [vmem:[#allocation10 + $0x430] sm:$0xff]  ;;  %v582_v42 = vld [vmem:[#allocation10 + $0x438] sm:$0xff] }
  0x6c   :  { %v542_v10 = vmul.f32 %v539_v54, %v2076_v9  ;;  %v2087_v38 = vadd.f32 %v540_v3, %v1943_v63  ;;  %v551_v11 = vmul.f32 %v548_v2, %v2076_v9  ;;  %v2091_v40 = vadd.f32 %v549_v31, %v1949_v59  ;;  %v574_v63 = vld [vmem:[#allocation10 + $0x428] sm:$0xff]  ;;  %v583_v54 = vld [vmem:[#allocation10 + $0x440] sm:$0xff] }
  0x6d   :  { %v2094_v22 = vadd.f32 %v541_v45, %v1946_v35  ;;  %v2097_v32 = vadd.f32 %v550_v60, %v1952_v52  ;;  %v560_v12 = vmul.f32 %v557_v33, %v2076_v9  ;;  %v2101_v49 = vadd.f32 %v558_v13, %v1962_v16  ;;  %v584_v2 = vld [vmem:[#allocation10 + $0x448] sm:$0xff]  ;;  %v591_v33 = vld [vmem:[#allocation10 + $0x450] sm:$0xff]  ;;  %v592_v60 = vld [vmem:[#allocation10 + $0x458] sm:$0xff] }
  0x6e   :  { %v2104_v20 = vadd.f32 %v542_v10, %v1955_v24  ;;  %v2107_v59 = vadd.f32 %v551_v11, %v1958_v43  ;;  %v2110_v35 = vadd.f32 %v559_v62, %v1965_v55  ;;  %v568_v52 = vmul.f32 %v565_v34, %v2062_v36  ;;  %v601_v10 = vld [vmem:[#allocation10 + $0x470] sm:$0xff]  ;;  %v602_v11 = vld [vmem:[#allocation10 + $0x478] sm:$0xff] }
  0x6f   :  { %v2114_v3 = vadd.f32 %v560_v12, %v1971_v15  ;;  %v569_v16 = vmul.f32 %v566_v30, %v2076_v9  ;;  %v2118_v31 = vadd.f32 %v567_v6, %v1977_v19  ;;  %v576_v24 = vmul.f32 %v573_v5, %v2060_v8  ;;  %v593_v15 = vld [vmem:[#allocation10 + $0x460] sm:$0xff]  ;;  %v600_v6 = vld [vmem:[#allocation10 + $0x468] sm:$0xff] }
  0x70   :  { %v2122_v43 = vadd.f32 %v568_v52, %v1980_v58  ;;  %v577_v55 = vmul.f32 %v574_v63, %v2062_v36  ;;  %v578_v13 = vmul.f32 %v575_v28, %v2076_v9  ;;  %v585_v45 = vmul.f32 %v582_v42, %v2060_v8  ;;  %v610_v63 = vld [vmem:[#allocation10 + $0x488] sm:$0xff]  ;;  %v611_v52 = vld [vmem:[#allocation10 + $0x490] sm:$0xff] }
  0x71   :  { %v2130_v62 = vadd.f32 %v569_v16, %v1983_v25  ;;  %v2133_v19 = vadd.f32 %v576_v24, %v1987_v61  ;;  %v586_v34 = vmul.f32 %v583_v54, %v2062_v36  ;;  %v587_v58 = vmul.f32 %v584_v2, %v2076_v9  ;;  %v609_v61 = vld [vmem:[#allocation10 + $0x480] sm:$0xff]  ;;  %v618_v24 = vld [vmem:[#allocation10 + $0x498] sm:$0xff] }
  0x72   :  { %v2138_v30 = vadd.f32 %v577_v55, %v1990_v4  ;;  %v2141_v5 = vadd.f32 %v578_v13, %v1993_v48  ;;  %v2144_v12 = vadd.f32 %v585_v45, %v1998_v27  ;;  %v594_v25 = vmul.f32 %v591_v33, %v2060_v8 }
  0x73   :  { %v2150_v28 = vadd.f32 %v586_v34, %v2003_v17  ;;  %v2153_v42 = vadd.f32 %v587_v58, %v2009_v29  ;;  %v595_v4 = vmul.f32 %v592_v60, %v2062_v36  ;;  %v596_v48 = vmul.f32 %v593_v15, %v2076_v9  ;;  %v619_v17 = vld [vmem:[#allocation10 + $0x4a0] sm:$0xff] }
  0x74   :  { %v2158_v27 = vadd.f32 %v594_v25, %v2012_v57  ;;  %v603_v54 = vmul.f32 %v600_v6, %v2060_v8  ;;  %v604_v2 = vmul.f32 %v601_v10, %v2062_v36  ;;  %v605_v16 = vmul.f32 %v602_v11, %v2076_v9  ;;  %v620_v57 = vld [vmem:[#allocation10 + $0x4a8] sm:$0xff]  ;;  %v638_v10 = vld [vmem:[#allocation10 + $0x4b0] sm:$0xff]  ;;  %v639_v11 = vld [vmem:[#allocation10 + $0x4b8] sm:$0xff] }
  0x75   :  { %v2164_v33 = vadd.f32 %v595_v4, %v2015_v37  ;;  %v2167_v29 = vadd.f32 %v596_v48, %v2019_v41  ;;  %v612_v55 = vmul.f32 %v609_v61, %v2060_v8  ;;  %v613_v13 = vmul.f32 %v610_v63, %v2062_v36  ;;  %v648_v25 = vld [vmem:[#allocation10 + $0x4d0] sm:$0xff]  ;;  %v656_v4 = vld [vmem:[#allocation10 + $0x4e0] sm:$0xff]  ;;  %v657_v48 = vld [vmem:[#allocation10 + $0x4e8] sm:$0xff] }
  0x76   :  { %v2172_v45 = vadd.f32 %v603_v54, %v2022_v53  ;;  %v2175_v60 = vadd.f32 %v604_v2, %v2025_v26  ;;  %v2178_v15 = vadd.f32 %v605_v16, %v2029_v50  ;;  %v614_v37 = vmul.f32 %v611_v52, %v2076_v9 }
  0x77   :  { %v2182_v34 = vadd.f32 %v612_v55, %v2035_v18  ;;  %v2185_v41 = vadd.f32 %v613_v13, %v2042_v47  ;;  %v621_v58 = vmul.f32 %v618_v24, %v2060_v8  ;;  %v622_v53 = vmul.f32 %v619_v17, %v2062_v36  ;;  %v640_v36 = vld [vmem:[#allocation10 + $0x4c0] sm:$0xff]  ;;  %v665_v13 = vld [vmem:[#allocation10 + $0x4f8] sm:$0xff] }
  0x78   :  { %v2190_v6 = vadd.f32 %v614_v37, %v2045_v7  ;;  %v623_v26 = vmul.f32 %v620_v57, %v2076_v9  ;;  %v632_v50 = vadd.f32 %v1932_v14, %v2066_v39  ;;  %v633_v18 = vadd.f32 %v1932_v14, %v2070_v56  ;;  %v647_v9 = vld [vmem:[#allocation10 + $0x4c8] sm:$0xff]  ;;  %v666_v57 = vld [vmem:[#allocation10 + $0x500] sm:$0xff] }
  0x79   :  { %v2198_v47 = vadd.f32 %v621_v58, %v2048_v51  ;;  %v2201_v8 = vadd.f32 %v622_v53, %v2053_v23  ;;  %v634_v7 = vadd.f32 %v1932_v14, %v2074_v46  ;;  %v728_v61 = vstv %s2127_s13  ;;  %v649_v51 = vld [vmem:[#allocation10 + $0x4d8] sm:$0xff]  ;;  %v667_v37 = vld [vmem:[#allocation10 + $0x508] sm:$0xff]  ;;  %s3035_s13 = sld [smem:[#allocation13 + $0x9]] }
  0x7a   :  { %v2207_v39 = vadd.f32 %v623_v26, %v2056_v21  ;;  %v2209_v56 = vmax.f32 %v632_v50, 0.0  ;;  %v2211_v63 = vmax.f32 %v633_v18, 0.0  ;;  %v2214_v23 = vmul.f32 %v728_v61, %v1554_v0  ;;  %v658_v0 = vld [vmem:[#allocation10 + $0x4f0] sm:$0xff] }
  0x7b   :  { %v2216_v52 = vmax.f32 %v634_v7, 0.0  ;;  %v2219_v14 = vmul.f32 %v728_v61, %v1556_v1  ;;  %v2222_v46 = vmul.f32 %v728_v61, %v3070_v44  ;;  %v2225_v21 = vstv %s2147_s14  ;;  %v674_v18 = vld [vmem:[#allocation10 + $0x510] sm:$0xff] }
  0x7c   :  { %v641_v54 = vmul.f32 %v638_v10, %v2209_v56  ;;  %v642_v2 = vmul.f32 %v639_v11, %v2211_v63  ;;  %v650_v16 = vmul.f32 %v647_v9, %v2209_v56  ;;  %v651_v24 = vmul.f32 %v648_v25, %v2211_v63  ;;  %v675_v10 = vld [vmem:[#allocation10 + $0x518] sm:$0xff]  ;;  %v676_v11 = vld [vmem:[#allocation10 + $0x520] sm:$0xff]  ;;  %v683_v9 = vld [vmem:[#allocation10 + $0x528] sm:$0xff] }
  0x7d   :  { %v643_v17 = vmul.f32 %v640_v36, %v2216_v52  ;;  %v652_v55 = vmul.f32 %v649_v51, %v2216_v52  ;;  %v659_v1 = vmul.f32 %v656_v4, %v2209_v56  ;;  %v660_v44 = vmul.f32 %v657_v48, %v2211_v63  ;;  %v685_v48 = vld [vmem:[#allocation10 + $0x538] sm:$0xff] }
  0x7e   :  { %v2236_v58 = vadd.f32 %v641_v54, %v2087_v38  ;;  %v2239_v53 = vadd.f32 %v642_v2, %v2094_v22  ;;  %v2242_v26 = vadd.f32 %v650_v16, %v2091_v40  ;;  %v2245_v50 = vadd.f32 %v651_v24, %v2097_v32  ;;  %v692_v54 = vld [vmem:[#allocation10 + $0x540] sm:$0xff] }
  0x7f   :  { %v2248_v7 = vadd.f32 %v643_v17, %v2104_v20  ;;  %v2251_v36 = vadd.f32 %v652_v55, %v2107_v59  ;;  %v661_v38 = vmul.f32 %v658_v0, %v2216_v52  ;;  %v2255_v22 = vadd.f32 %v659_v1, %v2101_v49  ;;  %v684_v20 = vld [vmem:[#allocation10 + $0x530] sm:$0xff]  ;;  %v701_v17 = vld [vmem:[#allocation10 + $0x558] sm:$0xff]  ;;  %v702_v55 = vld [vmem:[#allocation10 + $0x560] sm:$0xff] }
  0x80   :  { %v2258_v40 = vadd.f32 %v660_v44, %v2110_v35  ;;  %v668_v32 = vmul.f32 %v665_v13, %v2209_v56  ;;  %v669_v25 = vmul.f32 %v666_v57, %v2211_v63  ;;  %v670_v61 = vmul.f32 %v667_v37, %v2216_v52  ;;  %v693_v35 = vld [vmem:[#allocation10 + $0x548] sm:$0xff]  ;;  %v694_v0 = vld [vmem:[#allocation10 + $0x550] sm:$0xff] }
  0x81   :  { %v2264_v51 = vadd.f32 %v661_v38, %v2114_v3  ;;  %v677_v59 = vmul.f32 %v674_v18, %v2209_v56  ;;  %v678_v4 = vmul.f32 %v675_v10, %v2211_v63  ;;  %v679_v49 = vmul.f32 %v676_v11, %v2216_v52  ;;  %v710_v18 = vld [vmem:[#allocation10 + $0x570] sm:$0xff]  ;;  %v711_v38 = vld [vmem:[#allocation10 + $0x578] sm:$0xff] }
  0x82   :  { %v2272_v2 = vadd.f32 %v668_v32, %v2118_v31  ;;  %v2275_v16 = vadd.f32 %v669_v25, %v2122_v43  ;;  %v2278_v3 = vadd.f32 %v670_v61, %v2130_v62  ;;  %v686_v24 = vmul.f32 %v683_v9, %v2209_v56  ;;  %v703_v62 = vld [vmem:[#allocation10 + $0x568] sm:$0xff]  ;;  %v712_v9 = vld [vmem:[#allocation10 + $0x580] sm:$0xff] }
  0x83   :  { %v2284_v1 = vadd.f32 %v677_v59, %v2133_v19  ;;  %v2287_v44 = vadd.f32 %v678_v4, %v2138_v30  ;;  %v2290_v31 = vadd.f32 %v679_v49, %v2141_v5  ;;  %v687_v43 = vmul.f32 %v684_v20, %v2211_v63  ;;  %v719_v32 = vld [vmem:[#allocation10 + $0x588] sm:$0xff]  ;;  %v720_v20 = vld [vmem:[#allocation10 + $0x590] sm:$0xff]  ;;  %v721_v59 = vld [vmem:[#allocation10 + $0x598] sm:$0xff] }
  0x84   :  { %v688_v13 = vmul.f32 %v685_v48, %v2216_v52  ;;  %v2297_v57 = vadd.f32 %v686_v24, %v2144_v12  ;;  %v695_v37 = vmul.f32 %v692_v54, %v2209_v56  ;;  %v696_v19 = vmul.f32 %v693_v35, %v2211_v63 }
  0x85   :  { %v2302_v30 = vadd.f32 %v687_v43, %v2150_v28  ;;  %v697_v5 = vmul.f32 %v694_v0, %v2216_v52  ;;  %v704_v10 = vmul.f32 %v701_v17, %v2209_v56  ;;  %v705_v11 = vmul.f32 %v702_v55, %v2211_v63  ;;  %v739_v0 = vld [vmem:[#allocation10 + $0x5a0] sm:$0xff]  ;;  %v757_v55 = vld [vmem:[#allocation10 + $0x5d0] sm:$0xff] }
  0x86   :  { %v2308_v12 = vadd.f32 %v688_v13, %v2153_v42  ;;  %v2311_v25 = vadd.f32 %v695_v37, %v2158_v27  ;;  %v2314_v61 = vadd.f32 %v696_v19, %v2164_v33  ;;  %v706_v28 = vmul.f32 %v703_v62, %v2216_v52  ;;  %v758_v62 = vld [vmem:[#allocation10 + $0x5d8] sm:$0xff]  ;;  %v766_v13 = vld [vmem:[#allocation10 + $0x5e8] sm:$0xff] }
  0x87   :  { %v2318_v4 = vadd.f32 %v697_v5, %v2167_v29  ;;  %v2321_v49 = vadd.f32 %v704_v10, %v2172_v45  ;;  %v2324_v48 = vadd.f32 %v705_v11, %v2175_v60  ;;  %v713_v42 = vmul.f32 %v710_v18, %v2209_v56  ;;  %v750_v19 = vld [vmem:[#allocation10 + $0x5c8] sm:$0xff] }
  0x88   :  { %v2328_v27 = vadd.f32 %v706_v28, %v2178_v15  ;;  %v714_v33 = vmul.f32 %v711_v38, %v2211_v63  ;;  %v715_v54 = vmul.f32 %v712_v9, %v2216_v52  ;;  %v722_v35 = vmul.f32 %v719_v32, %v2209_v56  ;;  %v767_v28 = vld [vmem:[#allocation10 + $0x5f0] sm:$0xff] }
  0x89   :  { %v2334_v29 = vadd.f32 %v713_v42, %v2182_v34  ;;  %v723_v45 = vmul.f32 %v720_v20, %v2211_v63  ;;  %v724_v24 = vmul.f32 %v721_v59, %v2216_v52  ;;  %v733_v60 = vadd.f32 %v2225_v21, %v2214_v23  ;;  %v740_v63 = vld [vmem:[#allocation10 + $0x5a8] sm:$0xff]  ;;  %v748_v52 = vld [vmem:[#allocation10 + $0x5b8] sm:$0xff] }
  0x8a   :  { %v2341_v15 = vadd.f32 %v714_v33, %v2185_v41  ;;  %v2344_v17 = vadd.f32 %v715_v54, %v2190_v6  ;;  %v2347_v56 = vadd.f32 %v722_v35, %v2198_v47  ;;  %v734_v34 = vadd.f32 %v2225_v21, %v2219_v14  ;;  %v749_v47 = vld [vmem:[#allocation10 + $0x5c0] sm:$0xff]  ;;  %v741_v14 = vld [vmem:[#allocation10 + $0x5b0] sm:$0xff]  ;;  %v768_v35 = vld [vmem:[#allocation10 + $0x5f8] sm:$0xff] }
  0x8b   :  { %v2352_v23 = vadd.f32 %v723_v45, %v2201_v8  ;;  %v2355_v41 = vadd.f32 %v724_v24, %v2207_v39  ;;  %v735_v6 = vadd.f32 %v2225_v21, %v2222_v46  ;;  %v2359_v43 = vmax.f32 %v733_v60, 0.0  ;;  %v759_v21 = vld [vmem:[#allocation10 + $0x5e0] sm:$0xff] }
  0x8c   :  { %v2361_v37 = vmax.f32 %v734_v34, 0.0  ;;  %v2364_v18 = vstv %s2269_s15  ;;  %v2367_v5 = vstv %s2293_s16  ;;  %v2370_v8 = vstv %s2281_s0  ;;  %v775_v45 = vld [vmem:[#allocation10 + $0x600] sm:$0xff]  ;;  %s1489_s0 = smov [#allocation15]  }
  0x8d   :  { %v2372_v39 = vmax.f32 %v735_v6, 0.0  ;;  %v742_v10 = vmul.f32 %v739_v0, %v2359_v43  ;;  %v751_v46 = vmul.f32 %v748_v52, %v2359_v43  ;;  %v760_v11 = vmul.f32 %v757_v55, %v2359_v43  ;;  %v784_v52 = vld [vmem:[#allocation10 + $0x618] sm:$0xff]  ;;  %v785_v6 = vld [vmem:[#allocation10 + $0x620] sm:$0xff]  ;;  %s1280_s16 = sshll.u32 %s1489_s0, 4  ;;  %s1281_s16 = int_to_ptr.vmem [resolvable:$true] %s1280_s16 }
  0x8e   :  { %v743_v38 = vmul.f32 %v740_v63, %v2361_v37  ;;  %v752_v9 = vmul.f32 %v749_v47, %v2361_v37  ;;  %v761_v32 = vmul.f32 %v758_v62, %v2361_v37  ;;  %v769_v20 = vmul.f32 %v766_v13, %v2359_v43  ;;  %v777_v63 = vld [vmem:[#allocation10 + $0x610] sm:$0xff]  ;;  %v786_v47 = vld [vmem:[#allocation10 + $0x628] sm:$0xff] }
  0x8f   :  { %v744_v59 = vmul.f32 %v741_v14, %v2372_v39  ;;  %v2383_v42 = vadd.f32 %v742_v10, %v2236_v58  ;;  %v753_v33 = vmul.f32 %v750_v19, %v2372_v39  ;;  %v2387_v54 = vadd.f32 %v751_v46, %v2242_v26  ;;  %v776_v58 = vld [vmem:[#allocation10 + $0x608] sm:$0xff]  ;;  %v793_v14 = vld [vmem:[#allocation10 + $0x630] sm:$0xff]  ;;  %v794_v46 = vld [vmem:[#allocation10 + $0x638] sm:$0xff] }
  0x90   :  { %v2390_v24 = vadd.f32 %v743_v38, %v2239_v53  ;;  %v2393_v60 = vadd.f32 %v752_v9, %v2245_v50  ;;  %v762_v0 = vmul.f32 %v759_v21, %v2372_v39  ;;  %v2397_v34 = vadd.f32 %v760_v11, %v2255_v22  ;;  %v803_v9 = vld [vmem:[#allocation10 + $0x650] sm:$0xff] }
  0x91   :  { %v2400_v55 = vadd.f32 %v744_v59, %v2248_v7  ;;  %v2403_v26 = vadd.f32 %v753_v33, %v2251_v36  ;;  %v2406_v53 = vadd.f32 %v761_v32, %v2258_v40  ;;  %v770_v50 = vmul.f32 %v767_v28, %v2361_v37  ;;  %v804_v32 = vld [vmem:[#allocation10 + $0x658] sm:$0xff]  ;;  %v811_v59 = vld [vmem:[#allocation10 + $0x660] sm:$0xff]  ;;  %v812_v33 = vld [vmem:[#allocation10 + $0x668] sm:$0xff] }
  0x92   :  { %v2410_v62 = vadd.f32 %v762_v0, %v2264_v51  ;;  %v771_v22 = vmul.f32 %v768_v35, %v2372_v39  ;;  %v2414_v13 = vadd.f32 %v769_v20, %v2272_v2  ;;  %v778_v7 = vmul.f32 %v775_v45, %v2359_v43  ;;  %v795_v51 = vld [vmem:[#allocation10 + $0x640] sm:$0xff]  ;;  %v813_v0 = vld [vmem:[#allocation10 + $0x670] sm:$0xff] }
  0x93   :  { %v2418_v36 = vadd.f32 %v770_v50, %v2275_v16  ;;  %v779_v40 = vmul.f32 %v776_v58, %v2361_v37  ;;  %v780_v19 = vmul.f32 %v777_v63, %v2372_v39  ;;  %v787_v10 = vmul.f32 %v784_v52, %v2359_v43  ;;  %v802_v16 = vld [vmem:[#allocation10 + $0x648] sm:$0xff]  ;;  %v820_v50 = vld [vmem:[#allocation10 + $0x678] sm:$0xff] }
  0x94   :  { %v2424_v21 = vadd.f32 %v771_v22, %v2278_v3  ;;  %v2427_v2 = vadd.f32 %v778_v7, %v2284_v1  ;;  %v788_v11 = vmul.f32 %v785_v6, %v2361_v37  ;;  %v789_v38 = vmul.f32 %v786_v47, %v2372_v39 }
  0x95   :  { %v2434_v28 = vadd.f32 %v779_v40, %v2287_v44  ;;  %v2437_v20 = vadd.f32 %v780_v19, %v2290_v31  ;;  %v2440_v3 = vadd.f32 %v787_v10, %v2297_v57  ;;  %v796_v1 = vmul.f32 %v793_v14, %v2359_v43 }
  0x96   :  { %v2446_v35 = vadd.f32 %v788_v11, %v2302_v30  ;;  %v2449_v45 = vadd.f32 %v789_v38, %v2308_v12  ;;  %v797_v44 = vmul.f32 %v794_v46, %v2361_v37  ;;  %v798_v31 = vmul.f32 %v795_v51, %v2372_v39  ;;  %v821_v30 = vld [vmem:[#allocation10 + $0x680] sm:$0xff]  ;;  %v1344_v51 = vld [vmem:[#allocation3] sm:$0xff]  ;;  %v1345_v11 = vld [vmem:[#allocation3 + $0x8] sm:$0xff] }
  0x97   :  { %v2454_v57 = vadd.f32 %v796_v1, %v2311_v25  ;;  %v805_v58 = vmul.f32 %v802_v16, %v2359_v43  ;;  %v806_v63 = vmul.f32 %v803_v9, %v2361_v37  ;;  %v807_v52 = vmul.f32 %v804_v32, %v2372_v39  ;;  %v822_v25 = vld [vmem:[#allocation10 + $0x688] sm:$0xff]  ;;  %v840_v9 = vld [vmem:[#allocation10 + $0x690] sm:$0xff]  ;;  %v841_v32 = vld [vmem:[#allocation10 + $0x698] sm:$0xff] }
  0x98   :  { %v2460_v6 = vadd.f32 %v797_v44, %v2314_v61  ;;  %v2463_v12 = vadd.f32 %v798_v31, %v2318_v4  ;;  %v814_v47 = vmul.f32 %v811_v59, %v2359_v43  ;;  %v815_v22 = vmul.f32 %v812_v33, %v2361_v37  ;;  %v842_v59 = vld [vmem:[#allocation10 + $0x6a0] sm:$0xff]  ;;  %v849_v33 = vld [vmem:[#allocation10 + $0x6a8] sm:$0xff]  ;;  %v850_v44 = vld [vmem:[#allocation10 + $0x6b0] sm:$0xff] }
  0x99   :  { %v2468_v7 = vadd.f32 %v805_v58, %v2321_v49  ;;  %v2471_v14 = vadd.f32 %v806_v63, %v2324_v48  ;;  %v2474_v40 = vadd.f32 %v807_v52, %v2328_v27  ;;  %v816_v61 = vmul.f32 %v813_v0, %v2372_v39  ;;  %v851_v63 = vld [vmem:[#allocation10 + $0x6b8] sm:$0xff]  ;;  %v858_v52 = vld [vmem:[#allocation10 + $0x6c0] sm:$0xff] }
  0x9a   :  { %v2478_v19 = vadd.f32 %v814_v47, %v2334_v29  ;;  %v2481_v4 = vadd.f32 %v815_v22, %v2341_v15  ;;  %v823_v10 = vmul.f32 %v820_v50, %v2359_v43  ;;  %v824_v46 = vmul.f32 %v821_v30, %v2361_v37  ;;  %v2497_v43 = vld [vmem:[#allocation3 + $0x10] sm:$0xff]  ;;  %v859_v50 = vld [vmem:[#allocation10 + $0x6c8] sm:$0xff] }
  0x9b   :  { %v2486_v49 = vadd.f32 %v816_v61, %v2344_v17  ;;  %v825_v48 = vmul.f32 %v822_v25, %v2372_v39  ;;  %v830_v27 = vmul.f32 %v1344_v51, %v2364_v18  ;;  %v831_v38 = vmul.f32 %v1345_v11, %v2364_v18 }
  0x9c   :  { %v2492_v29 = vadd.f32 %v823_v10, %v2347_v56  ;;  %v2495_v15 = vadd.f32 %v824_v46, %v2352_v23  ;;  %v832_v17 = vmul.f32 %v2497_v43, %v2364_v18  ;;  %v931_v37 = vmul.f32 %v1344_v51, %v2370_v8 }
  0x9d   :  { %v2503_v39 = vadd.f32 %v825_v48, %v2355_v41  ;;  %v834_v16 = vadd.f32 %v2367_v5, %v830_v27  ;;  %v835_v56 = vadd.f32 %v2367_v5, %v831_v38  ;;  %v932_v23 = vmul.f32 %v1345_v11, %v2370_v8  ;;  %v860_v27 = vld [vmem:[#allocation10 + $0x6d0] sm:$0xff] }
  0x9e   :  { %v836_v1 = vadd.f32 %v2367_v5, %v832_v17  ;;  %v933_v18 = vmul.f32 %v2497_v43, %v2370_v8  ;;  %v934_v31 = vstv %s2443_s18  ;;  %v2513_v0 = vstv %s2431_s17 }
  0x9f   :  { %v2515_v41 = vmax.f32 %v834_v16, 0.0  ;;  %v2517_v58 = vmax.f32 %v835_v56, 0.0  ;;  %v2519_v30 = vadd.f32 %v934_v31, %v931_v37  ;;  %v2521_v47 = vadd.f32 %v934_v31, %v932_v23  ;;  %v867_v16 = vld [vmem:[#allocation10 + $0x6d8] sm:$0xff]  ;;  %v869_v56 = vld [vmem:[#allocation10 + $0x6e8] sm:$0xff] }
  0xa0   :  { %v2523_v5 = vmax.f32 %v836_v1, 0.0  ;;  %v2525_v22 = vadd.f32 %v934_v31, %v933_v18  ;;  %v2528_v8 = vmul.f32 %v1344_v51, %v2513_v0  ;;  %v2531_v25 = vmul.f32 %v1345_v11, %v2513_v0  ;;  %v868_v11 = vld [vmem:[#allocation10 + $0x6e0] sm:$0xff] }
  0xa1   :  { %v843_v61 = vmul.f32 %v840_v9, %v2515_v41  ;;  %v844_v10 = vmul.f32 %v841_v32, %v2517_v58  ;;  %v852_v46 = vmul.f32 %v849_v33, %v2515_v41  ;;  %v853_v48 = vmul.f32 %v850_v44, %v2517_v58  ;;  %v877_v33 = vld [vmem:[#allocation10 + $0x6f8] sm:$0xff]  ;;  %v878_v44 = vld [vmem:[#allocation10 + $0x700] sm:$0xff] }
  0xa2   :  { %v845_v38 = vmul.f32 %v842_v59, %v2523_v5  ;;  %v854_v17 = vmul.f32 %v851_v63, %v2523_v5  ;;  %v861_v37 = vmul.f32 %v858_v52, %v2515_v41  ;;  %v862_v51 = vmul.f32 %v859_v50, %v2517_v58  ;;  %v876_v59 = vld [vmem:[#allocation10 + $0x6f0] sm:$0xff]  ;;  %v885_v63 = vld [vmem:[#allocation10 + $0x708] sm:$0xff] }
  0xa3   :  { %v2542_v9 = vadd.f32 %v843_v61, %v2383_v42  ;;  %v2545_v32 = vadd.f32 %v844_v10, %v2390_v24  ;;  %v2548_v23 = vadd.f32 %v852_v46, %v2387_v54  ;;  %v2551_v1 = vadd.f32 %v853_v48, %v2393_v60  ;;  %v887_v46 = vld [vmem:[#allocation10 + $0x718] sm:$0xff]  ;;  %v894_v48 = vld [vmem:[#allocation10 + $0x720] sm:$0xff] }
  0xa4   :  { %v2554_v18 = vadd.f32 %v845_v38, %v2400_v55  ;;  %v2557_v31 = vadd.f32 %v854_v17, %v2403_v26  ;;  %v863_v42 = vmul.f32 %v860_v27, %v2523_v5  ;;  %v2561_v24 = vadd.f32 %v861_v37, %v2397_v34  ;;  %v886_v55 = vld [vmem:[#allocation10 + $0x710] sm:$0xff] }
  0xa5   :  { %v2564_v54 = vadd.f32 %v862_v51, %v2406_v53  ;;  %v870_v60 = vmul.f32 %v867_v16, %v2515_v41  ;;  %v871_v52 = vmul.f32 %v868_v11, %v2517_v58  ;;  %v872_v50 = vmul.f32 %v869_v56, %v2523_v5  ;;  %v895_v53 = vld [vmem:[#allocation10 + $0x728] sm:$0xff]  ;;  %v896_v37 = vld [vmem:[#allocation10 + $0x730] sm:$0xff]  ;;  %v903_v51 = vld [vmem:[#allocation10 + $0x738] sm:$0xff] }
  0xa6   :  { %v2570_v61 = vadd.f32 %v863_v42, %v2410_v62  ;;  %v879_v26 = vmul.f32 %v876_v59, %v2515_v41  ;;  %v880_v10 = vmul.f32 %v877_v33, %v2517_v58  ;;  %v881_v34 = vmul.f32 %v878_v44, %v2523_v5  ;;  %v904_v16 = vld [vmem:[#allocation10 + $0x740] sm:$0xff]  ;;  %v905_v59 = vld [vmem:[#allocation10 + $0x748] sm:$0xff] }
  0xa7   :  { %v2576_v27 = vadd.f32 %v870_v60, %v2414_v13  ;;  %v2579_v38 = vadd.f32 %v871_v52, %v2418_v36  ;;  %v2582_v17 = vadd.f32 %v872_v50, %v2424_v21  ;;  %v888_v62 = vmul.f32 %v885_v63, %v2515_v41  ;;  %v913_v52 = vld [vmem:[#allocation10 + $0x758] sm:$0xff]  ;;  %v914_v50 = vld [vmem:[#allocation10 + $0x760] sm:$0xff] }
  0xa8   :  { %v2586_v11 = vadd.f32 %v879_v26, %v2427_v2  ;;  %v2589_v56 = vadd.f32 %v880_v10, %v2434_v28  ;;  %v2592_v13 = vadd.f32 %v881_v34, %v2437_v20  ;;  %v889_v36 = vmul.f32 %v886_v55, %v2517_v58  ;;  %v912_v2 = vld [vmem:[#allocation10 + $0x750] sm:$0xff]  ;;  %v921_v55 = vld [vmem:[#allocation10 + $0x768] sm:$0xff] }
  0xa9   :  { %v890_v21 = vmul.f32 %v887_v46, %v2523_v5  ;;  %v2597_v33 = vadd.f32 %v888_v62, %v2440_v3  ;;  %v897_v44 = vmul.f32 %v894_v48, %v2515_v41  ;;  %v898_v42 = vmul.f32 %v895_v53, %v2517_v58  ;;  %v922_v34 = vld [vmem:[#allocation10 + $0x770] sm:$0xff]  ;;  %v923_v46 = vld [vmem:[#allocation10 + $0x778] sm:$0xff] }
  0xaa   :  { %v2602_v63 = vadd.f32 %v889_v36, %v2446_v35  ;;  %v899_v28 = vmul.f32 %v896_v37, %v2523_v5  ;;  %v906_v20 = vmul.f32 %v903_v51, %v2515_v41  ;;  %v907_v60 = vmul.f32 %v904_v16, %v2517_v58  ;;  %v941_v16 = vld [vmem:[#allocation10 + $0x780] sm:$0xff] }
  0xab   :  { %v2608_v3 = vadd.f32 %v890_v21, %v2449_v45  ;;  %v2611_v26 = vadd.f32 %v897_v44, %v2454_v57  ;;  %v2614_v10 = vadd.f32 %v898_v42, %v2460_v6  ;;  %v908_v35 = vmul.f32 %v905_v59, %v2523_v5  ;;  %v951_v21 = vld [vmem:[#allocation10 + $0x7a0] sm:$0xff]  ;;  %v959_v44 = vld [vmem:[#allocation10 + $0x7b0] sm:$0xff] }
  0xac   :  { %v2618_v48 = vadd.f32 %v899_v28, %v2463_v12  ;;  %v2621_v53 = vadd.f32 %v906_v20, %v2468_v7  ;;  %v2624_v62 = vadd.f32 %v907_v60, %v2471_v14  ;;  %v915_v45 = vmul.f32 %v912_v2, %v2515_v41  ;;  %v942_v12 = vld [vmem:[#allocation10 + $0x788] sm:$0xff]  ;;  %v960_v28 = vld [vmem:[#allocation10 + $0x7b8] sm:$0xff]  ;;  %v961_v60 = vld [vmem:[#allocation10 + $0x7c0] sm:$0xff] }
  0xad   :  { %v2628_v57 = vadd.f32 %v908_v35, %v2474_v40  ;;  %v916_v6 = vmul.f32 %v913_v52, %v2517_v58  ;;  %v917_v37 = vmul.f32 %v914_v50, %v2523_v5  ;;  %v924_v51 = vmul.f32 %v921_v55, %v2515_v41  ;;  %v950_v40 = vld [vmem:[#allocation10 + $0x798] sm:$0xff]  ;;  %v968_v55 = vld [vmem:[#allocation10 + $0x7c8] sm:$0xff] }
  0xae   :  { %v2634_v36 = vadd.f32 %v915_v45, %v2478_v19  ;;  %v925_v7 = vmul.f32 %v922_v34, %v2517_v58  ;;  %v926_v14 = vmul.f32 %v923_v46, %v2523_v5  ;;  %v2639_v59 = vmax.f32 %v2519_v30, 0.0  ;;  %v943_v58 = vld [vmem:[#allocation10 + $0x790] sm:$0xff]  ;;  %v952_v5 = vld [vmem:[#allocation10 + $0x7a8] sm:$0xff]  ;;  %v970_v46 = vld [vmem:[#allocation10 + $0x7d8] sm:$0xff] }
  0xaf   :  { %v2642_v42 = vadd.f32 %v916_v6, %v2481_v4  ;;  %v2645_v41 = vadd.f32 %v917_v37, %v2486_v49  ;;  %v2648_v2 = vadd.f32 %v924_v51, %v2492_v29  ;;  %v2651_v19 = vmax.f32 %v2521_v47, 0.0  ;;  %v969_v34 = vld [vmem:[#allocation10 + $0x7d0] sm:$0xff]  ;;  %v977_v45 = vld [vmem:[#allocation10 + $0x7e0] sm:$0xff] }
  0xb0   :  { %v2654_v30 = vadd.f32 %v925_v7, %v2495_v15  ;;  %v2657_v20 = vadd.f32 %v926_v14, %v2503_v39  ;;  %v2660_v4 = vmax.f32 %v2525_v22, 0.0  ;;  %v944_v49 = vmul.f32 %v941_v16, %v2639_v59  ;;  %v978_v16 = vld [vmem:[#allocation10 + $0x7e8] sm:$0xff]  ;;  %v986_v7 = vld [vmem:[#allocation10 + $0x7f8] sm:$0xff] }
  0xb1   :  { %v945_v29 = vmul.f32 %v942_v12, %v2651_v19  ;;  %v953_v47 = vmul.f32 %v950_v40, %v2639_v59  ;;  %v954_v52 = vmul.f32 %v951_v21, %v2651_v19  ;;  %v962_v50 = vmul.f32 %v959_v44, %v2639_v59  ;;  %v979_v12 = vld [vmem:[#allocation10 + $0x7f0] sm:$0xff] }
  0xb2   :  { %v946_v15 = vmul.f32 %v943_v58, %v2660_v4  ;;  %v2671_v39 = vadd.f32 %v944_v49, %v2542_v9  ;;  %v955_v22 = vmul.f32 %v952_v5, %v2660_v4  ;;  %v963_v35 = vmul.f32 %v960_v28, %v2651_v19  ;;  %v995_v49 = vld [vmem:[#allocation10 + $0x810] sm:$0xff] }
  0xb3   :  { %v2678_v6 = vadd.f32 %v945_v29, %v2545_v32  ;;  %v2681_v37 = vadd.f32 %v953_v47, %v2548_v23  ;;  %v2684_v51 = vadd.f32 %v954_v52, %v2551_v1  ;;  %v964_v9 = vmul.f32 %v961_v60, %v2660_v4  ;;  %v987_v1 = vld [vmem:[#allocation10 + $0x800] sm:$0xff] }
  0xb4   :  { %v2690_v14 = vadd.f32 %v946_v15, %v2554_v18  ;;  %v2693_v40 = vadd.f32 %v955_v22, %v2557_v31  ;;  %v2696_v32 = vadd.f32 %v962_v50, %v2561_v24  ;;  %v2699_v23 = vadd.f32 %v963_v35, %v2564_v54  ;;  %v988_v31 = vld [vmem:[#allocation10 + $0x808] sm:$0xff]  ;;  %v997_v50 = vld [vmem:[#allocation10 + $0x820] sm:$0xff]  ;;  %v1005_v15 = vld [vmem:[#allocation10 + $0x830] sm:$0xff] }
  0xb5   :  { %v2704_v21 = vadd.f32 %v964_v9, %v2570_v61  ;;  %v971_v44 = vmul.f32 %v968_v55, %v2639_v59  ;;  %v972_v18 = vmul.f32 %v969_v34, %v2651_v19  ;;  %v973_v58 = vmul.f32 %v970_v46, %v2660_v4  ;;  %v996_v61 = vld [vmem:[#allocation10 + $0x818] sm:$0xff]  ;;  %v1004_v55 = vld [vmem:[#allocation10 + $0x828] sm:$0xff]  ;;  %v1013_v34 = vld [vmem:[#allocation10 + $0x840] sm:$0xff] }
  0xb6   :  { %v980_v24 = vmul.f32 %v977_v45, %v2639_v59  ;;  %v981_v54 = vmul.f32 %v978_v16, %v2651_v19  ;;  %v982_v5 = vmul.f32 %v979_v12, %v2660_v4  ;;  %v989_v28 = vmul.f32 %v986_v7, %v2639_v59  ;;  %v1014_v9 = vld [vmem:[#allocation10 + $0x848] sm:$0xff]  ;;  %v1015_v7 = vld [vmem:[#allocation10 + $0x850] sm:$0xff] }
  0xb7   :  { %v2718_v60 = vadd.f32 %v971_v44, %v2576_v27  ;;  %v2721_v29 = vadd.f32 %v972_v18, %v2579_v38  ;;  %v2724_v47 = vadd.f32 %v973_v58, %v2582_v17  ;;  %v990_v52 = vmul.f32 %v987_v1, %v2651_v19  ;;  %v1006_v17 = vld [vmem:[#allocation10 + $0x838] sm:$0xff]  ;;  %v1023_v58 = vld [vmem:[#allocation10 + $0x860] sm:$0xff] }
  0xb8   :  { %v2730_v22 = vadd.f32 %v980_v24, %v2586_v11  ;;  %v2733_v35 = vadd.f32 %v981_v54, %v2589_v56  ;;  %v2736_v27 = vadd.f32 %v982_v5, %v2592_v13  ;;  %v991_v38 = vmul.f32 %v988_v31, %v2660_v4  ;;  %v1022_v1 = vld [vmem:[#allocation10 + $0x858] sm:$0xff]  ;;  %v1024_v31 = vld [vmem:[#allocation10 + $0x868] sm:$0xff] }
  0xb9   :  { %v2742_v46 = vadd.f32 %v989_v28, %v2597_v33  ;;  %v2745_v45 = vadd.f32 %v990_v52, %v2602_v63  ;;  %v998_v11 = vmul.f32 %v995_v49, %v2639_v59  ;;  %v999_v56 = vmul.f32 %v996_v61, %v2651_v19 }
  0xba   :  { %v2752_v13 = vadd.f32 %v991_v38, %v2608_v3  ;;  %v1000_v16 = vmul.f32 %v997_v50, %v2660_v4  ;;  %v1007_v12 = vmul.f32 %v1004_v55, %v2639_v59  ;;  %v1008_v33 = vmul.f32 %v1005_v15, %v2651_v19  ;;  %v1044_v55 = vld [vmem:[#allocation10 + $0x880] sm:$0xff]  ;;  %v1051_v15 = vld [vmem:[#allocation10 + $0x888] sm:$0xff]  ;;  %v1052_v38 = vld [vmem:[#allocation10 + $0x890] sm:$0xff] }
  0xbb   :  { %v2760_v63 = vadd.f32 %v998_v11, %v2611_v26  ;;  %v2763_v44 = vadd.f32 %v999_v56, %v2614_v10  ;;  %v1009_v18 = vmul.f32 %v1006_v17, %v2660_v4  ;;  %v1016_v3 = vmul.f32 %v1013_v34, %v2639_v59  ;;  %v1060_v11 = vld [vmem:[#allocation10 + $0x8a0] sm:$0xff]  ;;  %v1061_v56 = vld [vmem:[#allocation10 + $0x8a8] sm:$0xff] }
  0xbc   :  { %v2768_v24 = vadd.f32 %v1000_v16, %v2618_v48  ;;  %v2771_v54 = vadd.f32 %v1007_v12, %v2621_v53  ;;  %v2774_v26 = vadd.f32 %v1008_v33, %v2624_v62  ;;  %v1017_v10 = vmul.f32 %v1014_v9, %v2651_v19 }
  0xbd   :  { %v2778_v5 = vadd.f32 %v1009_v18, %v2628_v57  ;;  %v1018_v28 = vmul.f32 %v1015_v7, %v2660_v4  ;;  %v2782_v49 = vadd.f32 %v1016_v3, %v2634_v36  ;;  %v1025_v61 = vmul.f32 %v1022_v1, %v2639_v59 }
  0xbe   :  { %v2786_v48 = vadd.f32 %v1017_v10, %v2642_v42  ;;  %v1026_v53 = vmul.f32 %v1023_v58, %v2651_v19  ;;  %v1027_v62 = vmul.f32 %v1024_v31, %v2660_v4  ;;  %v1034_v52 = vmul.f32 %v2497_v43, %v2513_v0  ;;  %v1042_v0 = vld [vmem:[#allocation10 + $0x870] sm:$0xff] }
  0xbf   :  { %v2793_v57 = vadd.f32 %v1018_v28, %v2645_v41  ;;  %v2796_v36 = vadd.f32 %v1025_v61, %v2648_v2  ;;  %v1035_v59 = vstv %s2667_s19  ;;  %v2800_v50 = vstv %s2675_s20  ;;  %v1043_v41 = vld [vmem:[#allocation10 + $0x878] sm:$0xff]  ;;  %v1062_v10 = vld [vmem:[#allocation10 + $0x8b0] sm:$0xff]  ;;  %s1282_s19 = sshll.u32 %s3066_s7, 4  ;;  %s1283_s19 = int_to_ptr.hbm [resolvable:$true] %s1282_s19 }
  0xc0   :  { %v2803_v42 = vadd.f32 %v1026_v53, %v2654_v30  ;;  %v2806_v19 = vadd.f32 %v1027_v62, %v2657_v20  ;;  %v1036_v4 = vadd.f32 %v1035_v59, %v2528_v8  ;;  %v1037_v43 = vadd.f32 %v1035_v59, %v2531_v25  ;;  %v1053_v25 = vld [vmem:[#allocation10 + $0x898] sm:$0xff] }
  0xc1   :  { %v1038_v2 = vadd.f32 %v1035_v59, %v1034_v52  ;;  %v2811_v30 = vstv %s2727_s3  ;;  %v2814_v17 = vstv %s2687_s21  ;;  %v2817_v20 = vstv %s2739_s24  ;;  %v1069_v52 = vld [vmem:[#allocation10 + $0x8b8] sm:$0xff]  ;;  %v1070_v59 = vld [vmem:[#allocation10 + $0x8c0] sm:$0xff] }
  0xc2   :  { %v2819_v8 = vmax.f32 %v1036_v4, 0.0  ;;  %v2821_v34 = vmax.f32 %v1037_v43, 0.0  ;;  %v2824_v9 = vstv %s2701_s1  ;;  %v2827_v16 = vstv %s2749_s4  ;;  %v1071_v4 = vld [vmem:[#allocation10 + $0x8c8] sm:$0xff] }
  0xc3   :  { %v2829_v12 = vmax.f32 %v1038_v2, 0.0  ;;  %v2832_v33 = vstv %s2709_s22  ;;  %v2835_v7 = vstv %s2757_s5  ;;  %v2838_v1 = vstv %s2715_s23 }
  0xc4   :  { %v1045_v18 = vmul.f32 %v1042_v0, %v2819_v8  ;;  %v1046_v3 = vmul.f32 %v1043_v41, %v2821_v34  ;;  %v1054_v58 = vmul.f32 %v1051_v15, %v2819_v8  ;;  %v1055_v31 = vmul.f32 %v1052_v38, %v2821_v34  ;;  %v1079_v15 = vld [vmem:[#allocation10 + $0x8d8] sm:$0xff]  ;;  %v1080_v38 = vld [vmem:[#allocation10 + $0x8e0] sm:$0xff] }
  0xc5   :  { %v1047_v28 = vmul.f32 %v1044_v55, %v2829_v12  ;;  %v1056_v61 = vmul.f32 %v1053_v25, %v2829_v12  ;;  %v1063_v53 = vmul.f32 %v1060_v11, %v2819_v8  ;;  %v1064_v62 = vmul.f32 %v1061_v56, %v2821_v34  ;;  %v1078_v55 = vld [vmem:[#allocation10 + $0x8d0] sm:$0xff]  ;;  %v1087_v56 = vld [vmem:[#allocation10 + $0x8e8] sm:$0xff] }
  0xc6   :  { %v2849_v43 = vadd.f32 %v1045_v18, %v2671_v39  ;;  %v2852_v0 = vadd.f32 %v1046_v3, %v2678_v6  ;;  %v2855_v41 = vadd.f32 %v1054_v58, %v2681_v37  ;;  %v2858_v2 = vadd.f32 %v1055_v31, %v2684_v51 }
  0xc7   :  { %v2861_v25 = vadd.f32 %v1047_v28, %v2690_v14  ;;  %v2864_v11 = vadd.f32 %v1056_v61, %v2693_v40  ;;  %v1065_v39 = vmul.f32 %v1062_v10, %v2829_v12  ;;  %v2868_v6 = vadd.f32 %v1063_v53, %v2696_v32  ;;  %v1088_v14 = vld [vmem:[#allocation10 + $0x8f0] sm:$0xff]  ;;  %v1089_v10 = vld [vmem:[#allocation10 + $0x8f8] sm:$0xff]  ;;  %v1096_v28 = vld [vmem:[#allocation10 + $0x900] sm:$0xff] }
  0xc8   :  { %v2871_v37 = vadd.f32 %v1064_v62, %v2699_v23  ;;  %v1072_v51 = vmul.f32 %v1069_v52, %v2819_v8  ;;  %v1073_v18 = vmul.f32 %v1070_v59, %v2821_v34  ;;  %v1074_v3 = vmul.f32 %v1071_v4, %v2829_v12  ;;  %v1097_v23 = vld [vmem:[#allocation10 + $0x908] sm:$0xff]  ;;  %v1098_v52 = vld [vmem:[#allocation10 + $0x910] sm:$0xff]  ;;  %v1105_v59 = vld [vmem:[#allocation10 + $0x918] sm:$0xff] }
  0xc9   :  { %v2877_v58 = vadd.f32 %v1065_v39, %v2704_v21  ;;  %v1081_v40 = vmul.f32 %v1078_v55, %v2819_v8  ;;  %v1082_v31 = vmul.f32 %v1079_v15, %v2821_v34  ;;  %v1083_v32 = vmul.f32 %v1080_v38, %v2829_v12  ;;  %v1106_v4 = vld [vmem:[#allocation10 + $0x920] sm:$0xff]  ;;  %v1107_v38 = vld [vmem:[#allocation10 + $0x928] sm:$0xff] }
  0xca   :  { %v2883_v61 = vadd.f32 %v1072_v51, %v2718_v60  ;;  %v2886_v53 = vadd.f32 %v1073_v18, %v2721_v29  ;;  %v2889_v62 = vadd.f32 %v1074_v3, %v2724_v47  ;;  %v1090_v21 = vmul.f32 %v1087_v56, %v2819_v8 }
  0xcb   :  { %v2893_v55 = vadd.f32 %v1081_v40, %v2730_v22  ;;  %v2896_v15 = vadd.f32 %v1082_v31, %v2733_v35  ;;  %v2899_v60 = vadd.f32 %v1083_v32, %v2736_v27  ;;  %v1091_v29 = vmul.f32 %v1088_v14, %v2821_v34  ;;  %v1114_v22 = vld [vmem:[#allocation10 + $0x930] sm:$0xff]  ;;  %v1115_v14 = vld [vmem:[#allocation10 + $0x938] sm:$0xff]  ;;  %v1116_v40 = vld [vmem:[#allocation10 + $0x940] sm:$0xff] }
  0xcc   :  { %v1092_v47 = vmul.f32 %v1089_v10, %v2829_v12  ;;  %v2904_v39 = vadd.f32 %v1090_v21, %v2742_v46  ;;  %v1099_v56 = vmul.f32 %v1096_v28, %v2819_v8  ;;  %v1100_v51 = vmul.f32 %v1097_v23, %v2821_v34  ;;  %v1123_v31 = vld [vmem:[#allocation10 + $0x948] sm:$0xff]  ;;  %v1124_v28 = vld [vmem:[#allocation10 + $0x950] sm:$0xff]  ;;  %v1125_v23 = vld [vmem:[#allocation10 + $0x958] sm:$0xff] }
  0xcd   :  { %v2909_v18 = vadd.f32 %v1091_v29, %v2745_v45  ;;  %v1101_v35 = vmul.f32 %v1098_v52, %v2829_v12  ;;  %v1108_v27 = vmul.f32 %v1105_v59, %v2819_v8  ;;  %v1109_v3 = vmul.f32 %v1106_v4, %v2821_v34 }
  0xce   :  { %v2915_v46 = vadd.f32 %v1092_v47, %v2752_v13  ;;  %v2918_v32 = vadd.f32 %v1099_v56, %v2760_v63  ;;  %v2921_v10 = vadd.f32 %v1100_v51, %v2763_v44  ;;  %v1110_v45 = vmul.f32 %v1107_v38, %v2829_v12 }
  0xcf   :  { %v2925_v21 = vadd.f32 %v1101_v35, %v2768_v24  ;;  %v2928_v52 = vadd.f32 %v1108_v27, %v2771_v54  ;;  %v2931_v59 = vadd.f32 %v1109_v3, %v2774_v26  ;;  %v1117_v13 = vmul.f32 %v1114_v22, %v2819_v8 }
  0xd0   :  { %v2935_v63 = vadd.f32 %v1110_v45, %v2778_v5  ;;  %v1118_v44 = vmul.f32 %v1115_v14, %v2821_v34  ;;  %v1119_v4 = vmul.f32 %v1116_v40, %v2829_v12  ;;  %v1126_v29 = vmul.f32 %v1123_v31, %v2819_v8 }
  0xd1   :  { %v2941_v24 = vadd.f32 %v1117_v13, %v2782_v49  ;;  %v1127_v54 = vmul.f32 %v1124_v28, %v2821_v34  ;;  %v1128_v38 = vmul.f32 %v1125_v23, %v2829_v12  ;;  %v1133_v26 = vadd.f32 %v2800_v50, %v2849_v43 }
  0xd2   :  { %v2948_v47 = vadd.f32 %v1118_v44, %v2786_v48  ;;  %v2951_v5 = vadd.f32 %v1119_v4, %v2793_v57  ;;  %v2954_v56 = vadd.f32 %v1126_v29, %v2796_v36  ;;  %v1134_v49 = vadd.f32 %v2800_v50, %v2852_v0 }
  0xd3   :  { %v2959_v8 = vadd.f32 %v1127_v54, %v2803_v42  ;;  %v2962_v34 = vadd.f32 %v1128_v38, %v2806_v19  ;;  %v1135_v12 = vadd.f32 %v2800_v50, %v2861_v25  ;;  %v1136_v48 = vmax.f32 %v1133_v26, 0.0 }
  0xd4   :  { %v1137_v43 = vmax.f32 %v1134_v49, 0.0  ;;  %v1144_v57 = vadd.f32 %v2814_v17, %v2855_v41  ;;  %v1145_v36 = vadd.f32 %v2814_v17, %v2858_v2  ;;  %v1146_v0 = vadd.f32 %v2814_v17, %v2864_v11 }
  0xd5   :  { %v1138_v51 = vmax.f32 %v1135_v12, 0.0  ;;  %v1140_v42 = vmul.f32 %v2811_v30, %v1136_v48  ;;  %v1158_v19 = vadd.f32 %v2824_v9, %v2868_v6  ;;  %v1159_v50 = vadd.f32 %v2824_v9, %v2871_v37 }
  0xd6   :  { %v1141_v25 = vmul.f32 %v2811_v30, %v1137_v43  ;;  %v1147_v41 = vmax.f32 %v1144_v57, 0.0  ;;  %v1148_v22 = vmax.f32 %v1145_v36, 0.0  ;;  %v1149_v35 = vmax.f32 %v1146_v0, 0.0 }
  0xd7   :  { %v1142_v17 = vmul.f32 %v2811_v30, %v1138_v51  ;;  %v1160_v2 = vadd.f32 %v2824_v9, %v2877_v58  ;;  %v1161_v11 = vmax.f32 %v1158_v19, 0.0  ;;  %v1162_v27 = vmax.f32 %v1159_v50, 0.0 }
  0xd8   :  { %v1151_v6 = vmul.f32 %v2817_v20, %v1147_v41  ;;  %v1152_v37 = vmul.f32 %v2817_v20, %v1148_v22  ;;  %v1153_v3 = vmul.f32 %v2817_v20, %v1149_v35  ;;  %v1172_v14 = vadd.f32 %v2832_v33, %v2883_v61 }
  0xd9   :  { %v1163_v40 = vmax.f32 %v1160_v2, 0.0  ;;  %v1165_v31 = vmul.f32 %v2827_v16, %v1161_v11  ;;  %v1166_v30 = vmul.f32 %v2827_v16, %v1162_v27  ;;  %v1173_v9 = vadd.f32 %v2832_v33, %v2886_v53 }
  0xda   :  { %v1154_v58 = vadd.f32 %v1151_v6, %v1140_v42  ;;  %v1155_v45 = vadd.f32 %v1152_v37, %v1141_v25  ;;  %v1156_v28 = vadd.f32 %v1153_v3, %v1142_v17  ;;  %v1174_v20 = vadd.f32 %v2832_v33, %v2889_v62 }
  0xdb   :  { %v1167_v61 = vmul.f32 %v2827_v16, %v1163_v40  ;;  %v1175_v23 = vmax.f32 %v1172_v14, 0.0  ;;  %v1176_v13 = vmax.f32 %v1173_v9, 0.0  ;;  %v1186_v44 = vadd.f32 %v2838_v1, %v2893_v55 }
  0xdc   :  { %v1168_v4 = vadd.f32 %v1165_v31, %v1154_v58  ;;  %v1169_v53 = vadd.f32 %v1166_v30, %v1155_v45  ;;  %v1177_v29 = vmax.f32 %v1174_v20, 0.0  ;;  %v1187_v54 = vadd.f32 %v2838_v1, %v2896_v15 }
  0xdd   :  { %v1170_v33 = vadd.f32 %v1167_v61, %v1156_v28  ;;  %v1179_v16 = vmul.f32 %v2835_v7, %v1175_v23  ;;  %v1180_v62 = vmul.f32 %v2835_v7, %v1176_v13  ;;  %v1188_v38 = vadd.f32 %v2838_v1, %v2899_v60 }
  0xde   :  { %v1181_v55 = vmul.f32 %v2835_v7, %v1177_v29  ;;  %v1189_v26 = vmax.f32 %v1186_v44, 0.0  ;;  %v1190_v49 = vmax.f32 %v1187_v54, 0.0  ;;  %v1192_v12 = vstv %s2977_s25 }
  0xdf   :  { %v1182_v48 = vadd.f32 %v1179_v16, %v1168_v4  ;;  %v1183_v43 = vadd.f32 %v1180_v62, %v1169_v53  ;;  %v1191_v15 = vmax.f32 %v1188_v38, 0.0  ;;  %v1199_v57 = vstv %s2980_s26 }
  0xe0   :  { %v1184_v36 = vadd.f32 %v1181_v55, %v1170_v33  ;;  %v1193_v0 = vmul.f32 %v1192_v12, %v1189_v26  ;;  %v1194_v51 = vmul.f32 %v1192_v12, %v1190_v49  ;;  %v1200_v42 = vadd.f32 %v1199_v57, %v2904_v39 }
  0xe1   :  { %v1195_v1 = vmul.f32 %v1192_v12, %v1191_v15  ;;  %v1201_v7 = vadd.f32 %v1199_v57, %v2909_v18  ;;  %v1202_v60 = vadd.f32 %v1199_v57, %v2915_v46  ;;  %v1206_v19 = vstv %s2990_s27 }
  0xe2   :  { %v1196_v50 = vadd.f32 %v1193_v0, %v1182_v48  ;;  %v1197_v25 = vadd.f32 %v1194_v51, %v1183_v43  ;;  %v1203_v41 = vmax.f32 %v1200_v42, 0.0  ;;  %v1213_v22 = vstv %s2996_s28 }
  0xe3   :  { %v1198_v35 = vadd.f32 %v1195_v1, %v1184_v36  ;;  %v1204_v17 = vmax.f32 %v1201_v7, 0.0  ;;  %v1205_v2 = vmax.f32 %v1202_v60, 0.0  ;;  %v1214_v39 = vadd.f32 %v1213_v22, %v2918_v32 }
  0xe4   :  { %v1207_v11 = vmul.f32 %v1206_v19, %v1203_v41  ;;  %v1215_v18 = vadd.f32 %v1213_v22, %v2921_v10  ;;  %v1216_v46 = vadd.f32 %v1213_v22, %v2925_v21  ;;  %v1220_v27 = vstv %s3003_s29 }
  0xe5   :  { %v1208_v6 = vmul.f32 %v1206_v19, %v1204_v17  ;;  %v1209_v37 = vmul.f32 %v1206_v19, %v1205_v2  ;;  %v1217_v3 = vmax.f32 %v1214_v39, 0.0  ;;  %v1227_v14 = vstv %s3007_s30 }
  0xe6   :  { %v1210_v40 = vadd.f32 %v1207_v11, %v1196_v50  ;;  %v1218_v31 = vmax.f32 %v1215_v18, 0.0  ;;  %v1219_v30 = vmax.f32 %v1216_v46, 0.0  ;;  %v1228_v9 = vadd.f32 %v1227_v14, %v2928_v52 }
  0xe7   :  { %v1211_v32 = vadd.f32 %v1208_v6, %v1197_v25  ;;  %v1212_v58 = vadd.f32 %v1209_v37, %v1198_v35  ;;  %v1221_v45 = vmul.f32 %v1220_v27, %v1217_v3  ;;  %v1229_v10 = vadd.f32 %v1227_v14, %v2931_v59 }
  0xe8   :  { %v1222_v21 = vmul.f32 %v1220_v27, %v1218_v31  ;;  %v1223_v28 = vmul.f32 %v1220_v27, %v1219_v30  ;;  %v1230_v20 = vadd.f32 %v1227_v14, %v2935_v63  ;;  %v1231_v61 = vmax.f32 %v1228_v9, 0.0 }
  0xe9   :  { %v1224_v23 = vadd.f32 %v1221_v45, %v1210_v40  ;;  %v1232_v13 = vmax.f32 %v1229_v10, 0.0  ;;  %v1234_v44 = vstv %s3019_s9  ;;  %v1241_v4 = vstv %s3016_s8 }
  0xea   :  { %v1225_v53 = vadd.f32 %v1222_v21, %v1211_v32  ;;  %v1226_v52 = vadd.f32 %v1223_v28, %v1212_v58  ;;  %v1233_v29 = vmax.f32 %v1230_v20, 0.0  ;;  %v1235_v54 = vmul.f32 %v1234_v44, %v1231_v61 }
  0xeb   :  { %v1236_v33 = vmul.f32 %v1234_v44, %v1232_v13  ;;  %v1242_v16 = vadd.f32 %v1241_v4, %v2941_v24  ;;  %v1243_v59 = vadd.f32 %v1241_v4, %v2948_v47  ;;  %v1244_v62 = vadd.f32 %v1241_v4, %v2951_v5 }
  0xec   :  { %v1237_v63 = vmul.f32 %v1234_v44, %v1233_v29  ;;  %v1238_v38 = vadd.f32 %v1235_v54, %v1224_v23  ;;  %v1248_v55 = vstv %s3028_s2  ;;  %v1255_v26 = vstv %s3025_s12 }
  0xed   :  { %v1239_v49 = vadd.f32 %v1236_v33, %v1225_v53  ;;  %v1245_v12 = vmax.f32 %v1242_v16, 0.0  ;;  %v1246_v48 = vmax.f32 %v1243_v59, 0.0  ;;  %v1247_v43 = vmax.f32 %v1244_v62, 0.0 }
  0xee   :  { %v1240_v15 = vadd.f32 %v1237_v63, %v1226_v52  ;;  %v1256_v57 = vadd.f32 %v1255_v26, %v2954_v56  ;;  %v1257_v36 = vadd.f32 %v1255_v26, %v2959_v8  ;;  %v1258_v24 = vadd.f32 %v1255_v26, %v2962_v34 }
  0xef   :  { %v1249_v0 = vmul.f32 %v1248_v55, %v1245_v12  ;;  %v1250_v47 = vmul.f32 %v1248_v55, %v1246_v48  ;;  %v1251_v51 = vmul.f32 %v1248_v55, %v1247_v43  ;;  %v1262_v5 = vstv %s3035_s13 }
  0xf0   :  { %v1259_v42 = vmax.f32 %v1256_v57, 0.0  ;;  %v1260_v1 = vmax.f32 %v1257_v36, 0.0  ;;  %v1261_v7 = vmax.f32 %v1258_v24, 0.0  ;;  %v1269_v56 = vstv %s3065_s6 }
  0xf1   :  { %v1252_v60 = vadd.f32 %v1249_v0, %v1238_v38  ;;  %v1253_v19 = vadd.f32 %v1250_v47, %v1239_v49  ;;  %v1254_v50 = vadd.f32 %v1251_v51, %v1240_v15 }
  0xf2   :  { %v1263_v25 = vmul.f32 %v1262_v5, %v1259_v42  ;;  %v1264_v41 = vmul.f32 %v1262_v5, %v1260_v1  ;;  %v1265_v22 = vmul.f32 %v1262_v5, %v1261_v7 }
  0xf4   :  { %v1266_v8 = vadd.f32 %v1263_v25, %v1252_v60  ;;  %v1267_v35 = vadd.f32 %v1264_v41, %v1253_v19  ;;  %v1268_v34 = vadd.f32 %v1265_v22, %v1254_v50 }
  0xf6   :  { %v1270_v17 = vadd.f32 %v1269_v56, %v1266_v8  ;;  %v1271_v2 = vadd.f32 %v1269_v56, %v1267_v35  ;;  %v1272_v39 = vadd.f32 %v1269_v56, %v1268_v34 }
  0xf8   :  { %1273 = vst [vmem:[#allocation15] sm:$0xff] %v1270_v17 }
  0xf9   :  { %1274 = vst [vmem:[#allocation15 + $0x8] sm:$0xff] %v1271_v2 }
  0xfa   :  { %1275 = vst [vmem:[#allocation15 + $0x10] sm:$0xff] %v1272_v39 }
  0xfb   :  { %1288 = dma.vmem_to_hbm [thread:$0]  %s1281_s16, 384, %s1283_s19, [#allocation5], %s1483_s10, %s1483_s10, %s1484_s11  }
  0xfc   :  { %1479 = dma.done.wait [#allocation5], 384  }
  0xfd   :  { %1480 = vsyncadd [#allocation5], 4294966912 }
  0xfe   :  { %1293 = vsyncpa [#allocation4], 1 }
  0xff   :  { %1294 = vsyncpa [#allocation11], 1 }
 0x100   :  { %1295 = vsyncpa [#allocation5], 1 }
 0x101   :  { %1296 = vsyncpa [#allocation6], 1 }
 0x102   :  { %1297 = vsyncpa [#allocation9], 1 }
 0x103   :  { %1298 = vsyncpa [#allocation14], 1 }

</bundles_post_ra>
